<compile_context>
chip_gen: v6e
topology: v6e:2x2x1
jax: 0.10.0
libtpu: 0.0.40
codegen_flags: <defaults>
</compile_context>

<pallas_src>
import functools

import jax
import jax.numpy as jnp
from jax import lax
from jax.experimental import pallas as pl
from jax.experimental.pallas import tpu as pltpu

EPS = 1e-5                       # PyTorch LayerNorm default
VMEM_LIMIT = 32 * 1024 * 1024    # explicit scoped-VMEM limit for every call

# Matmul operand dtype. Flip to jnp.bfloat16 for MXU peak on v6e/v7x once
# close numerical agreement with the f32 PyTorch reference is not required
# (accumulation stays f32 via preferred_element_type either way).
MATMUL_DTYPE = jnp.float32


def _mm(a, b):
    """2-D matmul with controllable operand dtype and f32 accumulation."""
    return jnp.dot(a.astype(MATMUL_DTYPE), b.astype(MATMUL_DTYPE),
                   preferred_element_type=jnp.float32)


def _full_spec(arr):
    """Whole-array block that stays resident across the grid (weights/biases)."""
    nd = arr.ndim
    return pl.BlockSpec(arr.shape, lambda *_: (0,) * nd)


# ----------------------------------------------------------------------------
# Kernel 1: one BiLSTM layer, BOTH directions in a single grid step.
#   x_ref:    (T*B, I)   time-major flattened input (row = t*B + b)
#   wih_ref:  (I, 8H)    [W_ih_fwd^T | W_ih_bwd^T]
#   whh_f/b:  (H, 4H)    per-direction W_hh^T
#   b_ref:    (1, 8H)    [b_fwd | b_bwd]  (b_ih + b_hh per direction)
#   out_ref:  (T, B, 2H) fwd half in [..., :H], bwd half in [..., H:]
#   gx_ref:   (T*B, 8H)  VMEM scratch: hoisted input projection, both dirs
# PyTorch gate order: i, f, g, o.
# ----------------------------------------------------------------------------
def bilstm_layer_kernel(x_ref, wih_ref, whh_f_ref, whh_b_ref, b_ref,
                        out_ref, gx_ref, *, T, B):
    H = whh_f_ref.shape[0]
    G = 4 * H

    # Hoisted input projection: ONE (T*B, I) @ (I, 8H) MXU matmul + bias.
    gx_ref[...] = jnp.dot(x_ref[...].astype(MATMUL_DTYPE),
                          wih_ref[...].astype(MATMUL_DTYPE),
                          preferred_element_type=jnp.float32) + b_ref[...]

    whh_f = whh_f_ref[...].astype(MATMUL_DTYPE)   # resident across timesteps
    whh_b = whh_b_ref[...].astype(MATMUL_DTYPE)

    def act(gates, c):
        i_g = jax.nn.sigmoid(gates[:, 0:H])
        f_g = jax.nn.sigmoid(gates[:, H:2 * H])
        g_g = jnp.tanh(gates[:, 2 * H:3 * H])
        o_g = jax.nn.sigmoid(gates[:, 3 * H:4 * H])
        c_new = f_g * c + i_g * g_g
        return o_g * jnp.tanh(c_new), c_new

    def step(s, carry):
        h_f, c_f, h_b, c_b = carry
        tf = s                 # forward direction time index
        tb = T - 1 - s         # backward direction time index (no [::-1] copies)
        # Two INDEPENDENT recurrent matmuls + gate chains -> the scheduler
        # interleaves them (MXU drain of one hides the EUP chain of the other).
        gf = gx_ref[pl.ds(tf * B, B), 0:G] + jnp.dot(
            h_f.astype(MATMUL_DTYPE), whh_f, preferred_element_type=jnp.float32)
        gb = gx_ref[pl.ds(tb * B, B), G:2 * G] + jnp.dot(
            h_b.astype(MATMUL_DTYPE), whh_b, preferred_element_type=jnp.float32)
        h_f, c_f = act(gf, c_f)
        h_b, c_b = act(gb, c_b)
        out_ref[tf, :, 0:H] = h_f
        out_ref[tb, :, H:2 * H] = h_b
        return h_f, c_f, h_b, c_b

    z = jnp.zeros((B, H), jnp.float32)
    # Fully unroll short recurrences; partial unroll (8) for longer T keeps
    # LLO scheduling visibility without blowing vreg pressure.
    lax.fori_loop(0, T, step, (z, z, z, z), unroll=(T if T <= 16 else 8))


# ----------------------------------------------------------------------------
# Kernel 2 (fused attention + head), one batch element per grid step:
#   xn = LN1(x); attn = MHA(xn,xn,xn); y = LN1(attn + xn);
#   out = fc2(LN2(relu(fc1(y))))
#   x_ref: (T, D); W*: (D, D)/(D,H)/(H,Vp) pre-transposed; b*/ln*: (1, ·)
#   out_ref: (T, Vp)  (vocab padded to a multiple of 128 -> lane-dense store)
# ----------------------------------------------------------------------------
def attn_head_kernel(x_ref, ln1_g_ref, ln1_b_ref,
                     wq_ref, bq_ref, wk_ref, bk_ref, wv_ref, bv_ref,
                     wo_ref, bo_ref,
                     w1_ref, b1_ref, ln2_g_ref, ln2_b_ref, w2_ref, b2_ref,
                     out_ref, *, num_heads):
    x = x_ref[...]
    T, D = x.shape
    hd = D // num_heads
    scale = 1.0 / float(hd) ** 0.5

    def layernorm(v, g, b):
        mu = jnp.mean(v, axis=-1, keepdims=True)
        var = jnp.mean((v - mu) ** 2, axis=-1, keepdims=True)
        return (v - mu) * lax.rsqrt(var + EPS) * g + b

    # lstm_out = layer_norm1(lstm_out)  (reference overwrites lstm_out)
    xn = layernorm(x, ln1_g_ref[...], ln1_b_ref[...])

    # Q/K/V projections as full (T, D) @ (D, D) matmuls.
    q = _mm(xn, wq_ref[...]) + bq_ref[...]
    k = _mm(xn, wk_ref[...]) + bk_ref[...]
    v = _mm(xn, wv_ref[...]) + bv_ref[...]

    # Per-head attention (static Python loop; multi-batch-dim einsums are not
    # reliably lowered by Mosaic at these shapes), then a SINGLE output
    # projection on the concatenated heads.
    heads = []
    for h in range(num_heads):
        sl = slice(h * hd, (h + 1) * hd)
        s = jnp.einsum('td,sd->ts', q[:, sl], k[:, sl],
                       preferred_element_type=jnp.float32) * scale
        s = s - jnp.max(s, axis=-1, keepdims=True)
        p = jnp.exp(s)
        # full-precision reciprocal (approx=True contradicts parity with torch)
        p = p * pl.reciprocal(jnp.sum(p, axis=-1, keepdims=True), approx=False)
        heads.append(jnp.dot(p, v[:, sl], preferred_element_type=jnp.float32))
    o = jnp.concatenate(heads, axis=-1)                       # (T, D)
    attn = _mm(o, wo_ref[...]) + bo_ref[...]

    # attn_out = layer_norm1(attn_out + lstm_out)  (residual on NORMALIZED x)
    y = layernorm(attn + xn, ln1_g_ref[...], ln1_b_ref[...])

    h1 = jnp.maximum(_mm(y, w1_ref[...]) + b1_ref[...], 0.0)  # fc1 + ReLU
    hn = layernorm(h1, ln2_g_ref[...], ln2_b_ref[...])        # layer_norm2
    out_ref[...] = _mm(hn, w2_ref[...]) + b2_ref[...]         # fc2 (padded vocab)


# ----------------------------------------------------------------------------
# Parameter init (deterministic, matches PyTorch module shapes).
# ----------------------------------------------------------------------------
def init_params(key, vocab_size, embedding_dim, hidden_dim,
                num_layers=2, num_heads=4):
    D = 2 * hidden_dim
    Vp = ((vocab_size + 127) // 128) * 128     # lane-dense padded vocab
    keys = iter(jax.random.split(key, 64))

    def u(shape, scale=0.1):
        return jax.random.uniform(next(keys), shape, jnp.float32, -1.0, 1.0) * scale

    p = {'num_layers': num_layers, 'num_heads': num_heads,
         'vocab_size': vocab_size, 'hidden_dim': hidden_dim}
    p['embedding'] = u((vocab_size, embedding_dim), 1.0)

    lstm = []
    for layer in range(num_layers):
        in_size = embedding_dim if layer == 0 else D
        wih_dirs, whh_dirs, b_dirs = [], [], []
        for _dir in range(2):                   # 0 = forward, 1 = reverse
            w_ih = u((4 * hidden_dim, in_size))
            w_hh = u((4 * hidden_dim, hidden_dim))
            b_ih = u((4 * hidden_dim,))
            b_hh = u((4 * hidden_dim,))
            wih_dirs.append(w_ih.T)                     # (I, 4H)
            whh_dirs.append(w_hh.T)                     # (H, 4H)
            b_dirs.append(b_ih + b_hh)                  # (4H,)
        lstm.append({
            'wih': jnp.concatenate(wih_dirs, axis=1),           # (I, 8H)
            'whh_f': whh_dirs[0],
            'whh_b': whh_dirs[1],
            'b': jnp.concatenate(b_dirs).reshape(1, -1),        # (1, 8H)
        })
    p['lstm'] = lstm

    in_proj_w = u((3 * D, D))
    in_proj_b = u((3 * D,))
    p['wq_t'], p['bq'] = in_proj_w[0:D].T, in_proj_b[0:D].reshape(1, -1)
    p['wk_t'], p['bk'] = in_proj_w[D:2 * D].T, in_proj_b[D:2 * D].reshape(1, -1)
    p['wv_t'], p['bv'] = in_proj_w[2 * D:].T, in_proj_b[2 * D:].reshape(1, -1)
    wo, bo = u((D, D)), u((D,))
    p['wo_t'], p['bo'] = wo.T, bo.reshape(1, -1)

    p['ln1_g'] = jnp.ones((1, D), jnp.float32)
    p['ln1_b'] = jnp.zeros((1, D), jnp.float32)
    p['ln2_g'] = jnp.ones((1, hidden_dim), jnp.float32)
    p['ln2_b'] = jnp.zeros((1, hidden_dim), jnp.float32)

    w1, b1 = u((hidden_dim, D)), u((hidden_dim,))
    p['w1_t'], p['b1'] = w1.T, b1.reshape(1, -1)
    w2, b2 = u((vocab_size, hidden_dim)), u((vocab_size,))
    # pad vocab dim with zero columns -> padded logits are sliced off in wrapper
    p['w2_t'] = jnp.zeros((hidden_dim, Vp), jnp.float32).at[:, :vocab_size].set(w2.T)
    p['b2'] = jnp.zeros((1, Vp), jnp.float32).at[:, :vocab_size].set(b2.reshape(1, -1))
    return p


# ----------------------------------------------------------------------------
# Forward pass (glue in plain JAX, hot paths in Pallas kernels).
# ----------------------------------------------------------------------------
def forward(params, x_ids):
    B, T = x_ids.shape
    V = params['vocab_size']
    H = params['hidden_dim']
    D = 2 * H
    num_heads = params['num_heads']

    # Embedding lookup kept in plain JAX glue.
    # TODO(synk): embedding gather left outside Pallas (no clean small-shape
    #             DMA-gather win).  Dropout layers -> identity (eval mode).
    emb = jnp.take(params['embedding'], x_ids.T, axis=0).astype(jnp.float32)  # (T, B, E)
    x_flat = emb.reshape(T * B, -1)        # free row-major reshape, row = t*B + b

    # --- 2-layer bidirectional LSTM: one fused (both directions) call per layer
    out = None
    for layer in range(params['num_layers']):
        lw = params['lstm'][layer]
        I = lw['wih'].shape[0]
        out = pl.pallas_call(
            functools.partial(bilstm_layer_kernel, T=T, B=B),
            out_shape=jax.ShapeDtypeStruct((T, B, D), jnp.float32),
            grid_spec=pltpu.PrefetchScalarGridSpec(
                num_scalar_prefetch=0,
                grid=(1,),
                in_specs=[
                    pl.BlockSpec((T * B, I), lambda i: (0, 0)),
                    pl.BlockSpec((I, 8 * H), lambda i: (0, 0)),
                    pl.BlockSpec((H, 4 * H), lambda i: (0, 0)),
                    pl.BlockSpec((H, 4 * H), lambda i: (0, 0)),
                    pl.BlockSpec((1, 8 * H), lambda i: (0, 0)),
                ],
                out_specs=pl.BlockSpec((T, B, D), lambda i: (0, 0, 0)),
                scratch_shapes=[pltpu.VMEM((T * B, 8 * H), jnp.float32)],
            ),
            compiler_params=pltpu.CompilerParams(
                dimension_semantics=("arbitrary",),
                vmem_limit_bytes=VMEM_LIMIT),
        )(x_flat, lw['wih'], lw['whh_f'], lw['whh_b'], lw['b'])
        x_flat = out.reshape(T * B, D)     # free reshape -> next layer's input

    y_btd = jnp.transpose(out, (1, 0, 2))  # (B, T, D) for per-batch attention

    # --- fused: LN1 -> MHA -> residual -> LN1 -> fc1 -> ReLU -> LN2 -> fc2 ---
    weights = (params['ln1_g'], params['ln1_b'],
               params['wq_t'], params['bq'], params['wk_t'], params['bk'],
               params['wv_t'], params['bv'], params['wo_t'], params['bo'],
               params['w1_t'], params['b1'], params['ln2_g'], params['ln2_b'],
               params['w2_t'], params['b2'])
    Vp = params['w2_t'].shape[1]
    logits_padded = pl.pallas_call(
        functools.partial(attn_head_kernel, num_heads=num_heads),
        out_shape=jax.ShapeDtypeStruct((B, T, Vp), jnp.float32),
        grid_spec=pltpu.PrefetchScalarGridSpec(
            num_scalar_prefetch=0,
            grid=(B,),
            in_specs=[pl.BlockSpec((None, T, D), lambda bi: (bi, 0, 0))]
                     + [_full_spec(w) for w in weights],
            out_specs=pl.BlockSpec((None, T, Vp), lambda bi: (bi, 0, 0)),
        ),
        compiler_params=pltpu.CompilerParams(
            dimension_semantics=("parallel",),
            vmem_limit_bytes=VMEM_LIMIT),
    )(y_btd, *weights)

    return logits_padded[..., :V]


if __name__ == "__main__":
    key = jax.random.PRNGKey(0)
    vocab_size, embedding_dim, hidden_dim = 48, 32, 32   # small but shape-consistent
    B, T = 2, 8

    params = init_params(key, vocab_size, embedding_dim, hidden_dim,
                         num_layers=2, num_heads=4)
    x_ids = jax.random.randint(jax.random.fold_in(key, 123),
                               (B, T), 0, vocab_size, dtype=jnp.int32)

    logits = forward(params, x_ids)
    jax.block_until_ready(logits)
    assert logits.shape == (B, T, vocab_size)
    assert logits.dtype == jnp.float32
    print("KERNEL_OK")
</pallas_src>

<mosaic_0001>
module attributes {stable_mosaic.version = 11 : i64} {
  func.func @bilstm_layer_kernel(%arg0: i32, %arg1: memref<16x32xf32, #tpu.memory_space<vmem>>, %arg2: memref<32x256xf32, #tpu.memory_space<vmem>>, %arg3: memref<32x128xf32, #tpu.memory_space<vmem>>, %arg4: memref<32x128xf32, #tpu.memory_space<vmem>>, %arg5: memref<1x256xf32, #tpu.memory_space<vmem>>, %arg6: memref<8x2x64xf32, #tpu.memory_space<vmem>>, %arg7: memref<16x256xf32, #tpu.memory_space<vmem>>) attributes {dimension_semantics = [#tpu.dimension_semantics<arbitrary>], iteration_bounds = array<i64: 1>, scalar_prefetch = 0 : i64, scratch_operands = 1 : i64, tpu.core_type = #tpu.core_type<tc>, window_params = [{pipeline_mode = #tpu.pipeline_mode<synchronous>, transform_indices = @transform_0, window_bounds = array<i64: 16, 32>}, {pipeline_mode = #tpu.pipeline_mode<synchronous>, transform_indices = @transform_1, window_bounds = array<i64: 32, 256>}, {pipeline_mode = #tpu.pipeline_mode<synchronous>, transform_indices = @transform_2, window_bounds = array<i64: 32, 128>}, {pipeline_mode = #tpu.pipeline_mode<synchronous>, transform_indices = @transform_3, window_bounds = array<i64: 32, 128>}, {pipeline_mode = #tpu.pipeline_mode<synchronous>, transform_indices = @transform_4, window_bounds = array<i64: 1, 256>}, {pipeline_mode = #tpu.pipeline_mode<synchronous>, transform_indices = @transform_5, window_bounds = array<i64: 8, 2, 64>}]} {
    %c0 = arith.constant 0 : index
    %c0_0 = arith.constant 0 : index
    %0 = vector.load %arg1[%c0, %c0_0] : memref<16x32xf32, #tpu.memory_space<vmem>>, vector<16x32xf32>
    %c0_1 = arith.constant 0 : index
    %c0_2 = arith.constant 0 : index
    %1 = vector.load %arg2[%c0_1, %c0_2] : memref<32x256xf32, #tpu.memory_space<vmem>>, vector<32x256xf32>
    %cst = arith.constant dense<0.000000e+00> : vector<16x256xf32>
    %2 = tpu.matmul %0, %1, %cst {dimension_numbers = #tpu.dot_dimension_numbers<[1], [0], [0], [1], [0, 0, 1, 1], [], []>} : vector<16x32xf32>, vector<32x256xf32>, vector<16x256xf32> -> vector<16x256xf32>
    %c0_3 = arith.constant 0 : index
    %c0_4 = arith.constant 0 : index
    %3 = vector.load %arg5[%c0_3, %c0_4] : memref<1x256xf32, #tpu.memory_space<vmem>>, vector<1x256xf32>
    %4 = vector.broadcast %3 : vector<1x256xf32> to vector<16x256xf32>
    %5 = arith.addf %2, %4 : vector<16x256xf32>
    %c0_5 = arith.constant 0 : index
    %c0_6 = arith.constant 0 : index
    %6 = vector.load %arg7[%c0_5, %c0_6] : memref<16x256xf32, #tpu.memory_space<vmem>>, vector<16x256xf32>
    tpu.vector_store %arg7[%c0_5, %c0_6], %5 {strides = array<i32>} : memref<16x256xf32, #tpu.memory_space<vmem>>, vector<16x256xf32>,
    %c0_7 = arith.constant 0 : index
    %c0_8 = arith.constant 0 : index
    %7 = vector.load %arg3[%c0_7, %c0_8] : memref<32x128xf32, #tpu.memory_space<vmem>>, vector<32x128xf32>
    %c0_9 = arith.constant 0 : index
    %c0_10 = arith.constant 0 : index
    %8 = vector.load %arg4[%c0_9, %c0_10] : memref<32x128xf32, #tpu.memory_space<vmem>>, vector<32x128xf32>
    %cst_11 = arith.constant 0.000000e+00 : f32
    %9 = vector.broadcast %cst_11 : f32 to vector<2x32xf32>
    %c0_i32 = arith.constant 0 : i32
    %c7_i32 = arith.constant 7 : i32
    %10 = arith.subi %c7_i32, %c0_i32 : i32
    %c2_i32 = arith.constant 2 : i32
    %11 = arith.muli %c0_i32, %c2_i32 : i32
    %12 = arith.index_cast %11 : i32 to index
    %c0_12 = arith.constant 0 : index
    %13 = vector.load %arg7[%12, %c0_12] : memref<16x256xf32, #tpu.memory_space<vmem>>, vector<2x128xf32>
    %cst_13 = arith.constant dense<0.000000e+00> : vector<2x128xf32>
    %14 = tpu.matmul %9, %7, %cst_13 {dimension_numbers = #tpu.dot_dimension_numbers<[1], [0], [0], [1], [0, 0, 1, 1], [], []>} : vector<2x32xf32>, vector<32x128xf32>, vector<2x128xf32> -> vector<2x128xf32>
    %15 = arith.addf %13, %14 : vector<2x128xf32>
    %c2_i32_14 = arith.constant 2 : i32
    %16 = arith.muli %10, %c2_i32_14 : i32
    %17 = arith.index_cast %16 : i32 to index
    %c128 = arith.constant 128 : index
    %18 = vector.load %arg7[%17, %c128] : memref<16x256xf32, #tpu.memory_space<vmem>>, vector<2x128xf32>
    %cst_15 = arith.constant dense<0.000000e+00> : vector<2x128xf32>
    %19 = tpu.matmul %9, %8, %cst_15 {dimension_numbers = #tpu.dot_dimension_numbers<[1], [0], [0], [1], [0, 0, 1, 1], [], []>} : vector<2x32xf32>, vector<32x128xf32>, vector<2x128xf32> -> vector<2x128xf32>
    %20 = arith.addf %18, %19 : vector<2x128xf32>
    %21 = vector.extract_strided_slice %15 {offsets = [0, 0], sizes = [2, 32], strides = [1, 1]} : vector<2x128xf32> to vector<2x32xf32>
    %22 = arith.negf %21 : vector<2x32xf32>
    %23 = math.exp %22 : vector<2x32xf32>
    %cst_16 = arith.constant 1.000000e+00 : f32
    %24 = vector.broadcast %cst_16 : f32 to vector<2x32xf32>
    %25 = arith.addf %24, %23 : vector<2x32xf32>
    %26 = arith.divf %24, %25 : vector<2x32xf32>
    %27 = vector.extract_strided_slice %15 {offsets = [0, 32], sizes = [2, 32], strides = [1, 1]} : vector<2x128xf32> to vector<2x32xf32>
    %28 = arith.negf %27 : vector<2x32xf32>
    %29 = math.exp %28 : vector<2x32xf32>
    %cst_17 = arith.constant 1.000000e+00 : f32
    %30 = vector.broadcast %cst_17 : f32 to vector<2x32xf32>
    %31 = arith.addf %30, %29 : vector<2x32xf32>
    %32 = arith.divf %30, %31 : vector<2x32xf32>
    %33 = vector.extract_strided_slice %15 {offsets = [0, 64], sizes = [2, 32], strides = [1, 1]} : vector<2x128xf32> to vector<2x32xf32>
    %34 = math.tanh %33 : vector<2x32xf32>
    %35 = vector.extract_strided_slice %15 {offsets = [0, 96], sizes = [2, 32], strides = [1, 1]} : vector<2x128xf32> to vector<2x32xf32>
    %36 = arith.negf %35 : vector<2x32xf32>
    %37 = math.exp %36 : vector<2x32xf32>
    %cst_18 = arith.constant 1.000000e+00 : f32
    %38 = vector.broadcast %cst_18 : f32 to vector<2x32xf32>
    %39 = arith.addf %38, %37 : vector<2x32xf32>
    %40 = arith.divf %38, %39 : vector<2x32xf32>
    %41 = arith.mulf %32, %9 : vector<2x32xf32>
    %42 = arith.mulf %26, %34 : vector<2x32xf32>
    %43 = arith.addf %41, %42 : vector<2x32xf32>
    %44 = math.tanh %43 : vector<2x32xf32>
    %45 = arith.mulf %40, %44 : vector<2x32xf32>
    %46 = vector.extract_strided_slice %20 {offsets = [0, 0], sizes = [2, 32], strides = [1, 1]} : vector<2x128xf32> to vector<2x32xf32>
    %47 = arith.negf %46 : vector<2x32xf32>
    %48 = math.exp %47 : vector<2x32xf32>
    %cst_19 = arith.constant 1.000000e+00 : f32
    %49 = vector.broadcast %cst_19 : f32 to vector<2x32xf32>
    %50 = arith.addf %49, %48 : vector<2x32xf32>
    %51 = arith.divf %49, %50 : vector<2x32xf32>
    %52 = vector.extract_strided_slice %20 {offsets = [0, 32], sizes = [2, 32], strides = [1, 1]} : vector<2x128xf32> to vector<2x32xf32>
    %53 = arith.negf %52 : vector<2x32xf32>
    %54 = math.exp %53 : vector<2x32xf32>
    %cst_20 = arith.constant 1.000000e+00 : f32
    %55 = vector.broadcast %cst_20 : f32 to vector<2x32xf32>
    %56 = arith.addf %55, %54 : vector<2x32xf32>
    %57 = arith.divf %55, %56 : vector<2x32xf32>
    %58 = vector.extract_strided_slice %20 {offsets = [0, 64], sizes = [2, 32], strides = [1, 1]} : vector<2x128xf32> to vector<2x32xf32>
    %59 = math.tanh %58 : vector<2x32xf32>
    %60 = vector.extract_strided_slice %20 {offsets = [0, 96], sizes = [2, 32], strides = [1, 1]} : vector<2x128xf32> to vector<2x32xf32>
    %61 = arith.negf %60 : vector<2x32xf32>
    %62 = math.exp %61 : vector<2x32xf32>
    %cst_21 = arith.constant 1.000000e+00 : f32
    %63 = vector.broadcast %cst_21 : f32 to vector<2x32xf32>
    %64 = arith.addf %63, %62 : vector<2x32xf32>
    %65 = arith.divf %63, %64 : vector<2x32xf32>
    %66 = arith.mulf %57, %9 : vector<2x32xf32>
    %67 = arith.mulf %51, %59 : vector<2x32xf32>
    %68 = arith.addf %66, %67 : vector<2x32xf32>
    %69 = math.tanh %68 : vector<2x32xf32>
    %70 = arith.mulf %65, %69 : vector<2x32xf32>
    %71 = arith.index_cast %c0_i32 : i32 to index
    %c0_22 = arith.constant 0 : index
    %c0_23 = arith.constant 0 : index
    %72 = vector.load %arg6[%71, %c0_22, %c0_23] : memref<8x2x64xf32, #tpu.memory_space<vmem>>, vector<1x2x32xf32>
    %73 = vector.shape_cast %72 : vector<1x2x32xf32> to vector<2x32xf32>
    %74 = vector.shape_cast %45 : vector<2x32xf32> to vector<1x2x32xf32>
    tpu.vector_store %arg6[%71, %c0_22, %c0_23], %74 {strides = array<i32>} : memref<8x2x64xf32, #tpu.memory_space<vmem>>, vector<1x2x32xf32>,
    %75 = arith.index_cast %10 : i32 to index
    %c0_24 = arith.constant 0 : index
    %c32 = arith.constant 32 : index
    %76 = vector.load %arg6[%75, %c0_24, %c32] : memref<8x2x64xf32, #tpu.memory_space<vmem>>, vector<1x2x32xf32>
    %77 = vector.shape_cast %76 : vector<1x2x32xf32> to vector<2x32xf32>
    %78 = vector.shape_cast %70 : vector<2x32xf32> to vector<1x2x32xf32>
    tpu.vector_store %arg6[%75, %c0_24, %c32], %78 {strides = array<i32>} : memref<8x2x64xf32, #tpu.memory_space<vmem>>, vector<1x2x32xf32>,
    %c1_i32 = arith.constant 1 : i32
    %c7_i32_25 = arith.constant 7 : i32
    %79 = arith.subi %c7_i32_25, %c1_i32 : i32
    %c2_i32_26 = arith.constant 2 : i32
    %80 = arith.muli %c1_i32, %c2_i32_26 : i32
    %81 = arith.index_cast %80 : i32 to index
    %c0_27 = arith.constant 0 : index
    %82 = vector.load %arg7[%81, %c0_27] : memref<16x256xf32, #tpu.memory_space<vmem>>, vector<2x128xf32>
    %cst_28 = arith.constant dense<0.000000e+00> : vector<2x128xf32>
    %83 = tpu.matmul %45, %7, %cst_28 {dimension_numbers = #tpu.dot_dimension_numbers<[1], [0], [0], [1], [0, 0, 1, 1], [], []>} : vector<2x32xf32>, vector<32x128xf32>, vector<2x128xf32> -> vector<2x128xf32>
    %84 = arith.addf %82, %83 : vector<2x128xf32>
    %c2_i32_29 = arith.constant 2 : i32
    %85 = arith.muli %79, %c2_i32_29 : i32
    %86 = arith.index_cast %85 : i32 to index
    %c128_30 = arith.constant 128 : index
    %87 = vector.load %arg7[%86, %c128_30] : memref<16x256xf32, #tpu.memory_space<vmem>>, vector<2x128xf32>
    %cst_31 = arith.constant dense<0.000000e+00> : vector<2x128xf32>
    %88 = tpu.matmul %70, %8, %cst_31 {dimension_numbers = #tpu.dot_dimension_numbers<[1], [0], [0], [1], [0, 0, 1, 1], [], []>} : vector<2x32xf32>, vector<32x128xf32>, vector<2x128xf32> -> vector<2x128xf32>
    %89 = arith.addf %87, %88 : vector<2x128xf32>
    %90 = vector.extract_strided_slice %84 {offsets = [0, 0], sizes = [2, 32], strides = [1, 1]} : vector<2x128xf32> to vector<2x32xf32>
    %91 = arith.negf %90 : vector<2x32xf32>
    %92 = math.exp %91 : vector<2x32xf32>
    %cst_32 = arith.constant 1.000000e+00 : f32
    %93 = vector.broadcast %cst_32 : f32 to vector<2x32xf32>
    %94 = arith.addf %93, %92 : vector<2x32xf32>
    %95 = arith.divf %93, %94 : vector<2x32xf32>
    %96 = vector.extract_strided_slice %84 {offsets = [0, 32], sizes = [2, 32], strides = [1, 1]} : vector<2x128xf32> to vector<2x32xf32>
    %97 = arith.negf %96 : vector<2x32xf32>
    %98 = math.exp %97 : vector<2x32xf32>
    %cst_33 = arith.constant 1.000000e+00 : f32
    %99 = vector.broadcast %cst_33 : f32 to vector<2x32xf32>
    %100 = arith.addf %99, %98 : vector<2x32xf32>
    %101 = arith.divf %99, %100 : vector<2x32xf32>
    %102 = vector.extract_strided_slice %84 {offsets = [0, 64], sizes = [2, 32], strides = [1, 1]} : vector<2x128xf32> to vector<2x32xf32>
    %103 = math.tanh %102 : vector<2x32xf32>
    %104 = vector.extract_strided_slice %84 {offsets = [0, 96], sizes = [2, 32], strides = [1, 1]} : vector<2x128xf32> to vector<2x32xf32>
    %105 = arith.negf %104 : vector<2x32xf32>
    %106 = math.exp %105 : vector<2x32xf32>
    %cst_34 = arith.constant 1.000000e+00 : f32
    %107 = vector.broadcast %cst_34 : f32 to vector<2x32xf32>
    %108 = arith.addf %107, %106 : vector<2x32xf32>
    %109 = arith.divf %107, %108 : vector<2x32xf32>
    %110 = arith.mulf %101, %43 : vector<2x32xf32>
    %111 = arith.mulf %95, %103 : vector<2x32xf32>
    %112 = arith.addf %110, %111 : vector<2x32xf32>
    %113 = math.tanh %112 : vector<2x32xf32>
    %114 = arith.mulf %109, %113 : vector<2x32xf32>
    %115 = vector.extract_strided_slice %89 {offsets = [0, 0], sizes = [2, 32], strides = [1, 1]} : vector<2x128xf32> to vector<2x32xf32>
    %116 = arith.negf %115 : vector<2x32xf32>
    %117 = math.exp %116 : vector<2x32xf32>
    %cst_35 = arith.constant 1.000000e+00 : f32
    %118 = vector.broadcast %cst_35 : f32 to vector<2x32xf32>
    %119 = arith.addf %118, %117 : vector<2x32xf32>
    %120 = arith.divf %118, %119 : vector<2x32xf32>
    %121 = vector.extract_strided_slice %89 {offsets = [0, 32], sizes = [2, 32], strides = [1, 1]} : vector<2x128xf32> to vector<2x32xf32>
    %122 = arith.negf %121 : vector<2x32xf32>
    %123 = math.exp %122 : vector<2x32xf32>
    %cst_36 = arith.constant 1.000000e+00 : f32
    %124 = vector.broadcast %cst_36 : f32 to vector<2x32xf32>
    %125 = arith.addf %124, %123 : vector<2x32xf32>
    %126 = arith.divf %124, %125 : vector<2x32xf32>
    %127 = vector.extract_strided_slice %89 {offsets = [0, 64], sizes = [2, 32], strides = [1, 1]} : vector<2x128xf32> to vector<2x32xf32>
    %128 = math.tanh %127 : vector<2x32xf32>
    %129 = vector.extract_strided_slice %89 {offsets = [0, 96], sizes = [2, 32], strides = [1, 1]} : vector<2x128xf32> to vector<2x32xf32>
    %130 = arith.negf %129 : vector<2x32xf32>
    %131 = math.exp %130 : vector<2x32xf32>
    %cst_37 = arith.constant 1.000000e+00 : f32
    %132 = vector.broadcast %cst_37 : f32 to vector<2x32xf32>
    %133 = arith.addf %132, %131 : vector<2x32xf32>
    %134 = arith.divf %132, %133 : vector<2x32xf32>
    %135 = arith.mulf %126, %68 : vector<2x32xf32>
    %136 = arith.mulf %120, %128 : vector<2x32xf32>
    %137 = arith.addf %135, %136 : vector<2x32xf32>
    %138 = math.tanh %137 : vector<2x32xf32>
    %139 = arith.mulf %134, %138 : vector<2x32xf32>
    %140 = arith.index_cast %c1_i32 : i32 to index
    %c0_38 = arith.constant 0 : index
    %c0_39 = arith.constant 0 : index
    %141 = vector.load %arg6[%140, %c0_38, %c0_39] : memref<8x2x64xf32, #tpu.memory_space<vmem>>, vector<1x2x32xf32>
    %142 = vector.shape_cast %141 : vector<1x2x32xf32> to vector<2x32xf32>
    %143 = vector.shape_cast %114 : vector<2x32xf32> to vector<1x2x32xf32>
    tpu.vector_store %arg6[%140, %c0_38, %c0_39], %143 {strides = array<i32>} : memref<8x2x64xf32, #tpu.memory_space<vmem>>, vector<1x2x32xf32>,
    %144 = arith.index_cast %79 : i32 to index
    %c0_40 = arith.constant 0 : index
    %c32_41 = arith.constant 32 : index
    %145 = vector.load %arg6[%144, %c0_40, %c32_41] : memref<8x2x64xf32, #tpu.memory_space<vmem>>, vector<1x2x32xf32>
    %146 = vector.shape_cast %145 : vector<1x2x32xf32> to vector<2x32xf32>
    %147 = vector.shape_cast %139 : vector<2x32xf32> to vector<1x2x32xf32>
    tpu.vector_store %arg6[%144, %c0_40, %c32_41], %147 {strides = array<i32>} : memref<8x2x64xf32, #tpu.memory_space<vmem>>, vector<1x2x32xf32>,
    %c2_i32_42 = arith.constant 2 : i32
    %c7_i32_43 = arith.constant 7 : i32
    %148 = arith.subi %c7_i32_43, %c2_i32_42 : i32
    %c2_i32_44 = arith.constant 2 : i32
    %149 = arith.muli %c2_i32_42, %c2_i32_44 : i32
    %150 = arith.index_cast %149 : i32 to index
    %c0_45 = arith.constant 0 : index
    %151 = vector.load %arg7[%150, %c0_45] : memref<16x256xf32, #tpu.memory_space<vmem>>, vector<2x128xf32>
    %cst_46 = arith.constant dense<0.000000e+00> : vector<2x128xf32>
    %152 = tpu.matmul %114, %7, %cst_46 {dimension_numbers = #tpu.dot_dimension_numbers<[1], [0], [0], [1], [0, 0, 1, 1], [], []>} : vector<2x32xf32>, vector<32x128xf32>, vector<2x128xf32> -> vector<2x128xf32>
    %153 = arith.addf %151, %152 : vector<2x128xf32>
    %c2_i32_47 = arith.constant 2 : i32
    %154 = arith.muli %148, %c2_i32_47 : i32
    %155 = arith.index_cast %154 : i32 to index
    %c128_48 = arith.constant 128 : index
    %156 = vector.load %arg7[%155, %c128_48] : memref<16x256xf32, #tpu.memory_space<vmem>>, vector<2x128xf32>
    %cst_49 = arith.constant dense<0.000000e+00> : vector<2x128xf32>
    %157 = tpu.matmul %139, %8, %cst_49 {dimension_numbers = #tpu.dot_dimension_numbers<[1], [0], [0], [1], [0, 0, 1, 1], [], []>} : vector<2x32xf32>, vector<32x128xf32>, vector<2x128xf32> -> vector<2x128xf32>
    %158 = arith.addf %156, %157 : vector<2x128xf32>
    %159 = vector.extract_strided_slice %153 {offsets = [0, 0], sizes = [2, 32], strides = [1, 1]} : vector<2x128xf32> to vector<2x32xf32>
    %160 = arith.negf %159 : vector<2x32xf32>
    %161 = math.exp %160 : vector<2x32xf32>
    %cst_50 = arith.constant 1.000000e+00 : f32
    %162 = vector.broadcast %cst_50 : f32 to vector<2x32xf32>
    %163 = arith.addf %162, %161 : vector<2x32xf32>
    %164 = arith.divf %162, %163 : vector<2x32xf32>
    %165 = vector.extract_strided_slice %153 {offsets = [0, 32], sizes = [2, 32], strides = [1, 1]} : vector<2x128xf32> to vector<2x32xf32>
    %166 = arith.negf %165 : vector<2x32xf32>
    %167 = math.exp %166 : vector<2x32xf32>
    %cst_51 = arith.constant 1.000000e+00 : f32
    %168 = vector.broadcast %cst_51 : f32 to vector<2x32xf32>
    %169 = arith.addf %168, %167 : vector<2x32xf32>
    %170 = arith.divf %168, %169 : vector<2x32xf32>
    %171 = vector.extract_strided_slice %153 {offsets = [0, 64], sizes = [2, 32], strides = [1, 1]} : vector<2x128xf32> to vector<2x32xf32>
    %172 = math.tanh %171 : vector<2x32xf32>
    %173 = vector.extract_strided_slice %153 {offsets = [0, 96], sizes = [2, 32], strides = [1, 1]} : vector<2x128xf32> to vector<2x32xf32>
    %174 = arith.negf %173 : vector<2x32xf32>
    %175 = math.exp %174 : vector<2x32xf32>
    %cst_52 = arith.constant 1.000000e+00 : f32
    %176 = vector.broadcast %cst_52 : f32 to vector<2x32xf32>
    %177 = arith.addf %176, %175 : vector<2x32xf32>
    %178 = arith.divf %176, %177 : vector<2x32xf32>
    %179 = arith.mulf %170, %112 : vector<2x32xf32>
    %180 = arith.mulf %164, %172 : vector<2x32xf32>
    %181 = arith.addf %179, %180 : vector<2x32xf32>
    %182 = math.tanh %181 : vector<2x32xf32>
    %183 = arith.mulf %178, %182 : vector<2x32xf32>
    %184 = vector.extract_strided_slice %158 {offsets = [0, 0], sizes = [2, 32], strides = [1, 1]} : vector<2x128xf32> to vector<2x32xf32>
    %185 = arith.negf %184 : vector<2x32xf32>
    %186 = math.exp %185 : vector<2x32xf32>
    %cst_53 = arith.constant 1.000000e+00 : f32
    %187 = vector.broadcast %cst_53 : f32 to vector<2x32xf32>
    %188 = arith.addf %187, %186 : vector<2x32xf32>
    %189 = arith.divf %187, %188 : vector<2x32xf32>
    %190 = vector.extract_strided_slice %158 {offsets = [0, 32], sizes = [2, 32], strides = [1, 1]} : vector<2x128xf32> to vector<2x32xf32>
    %191 = arith.negf %190 : vector<2x32xf32>
    %192 = math.exp %191 : vector<2x32xf32>
    %cst_54 = arith.constant 1.000000e+00 : f32
    %193 = vector.broadcast %cst_54 : f32 to vector<2x32xf32>
    %194 = arith.addf %193, %192 : vector<2x32xf32>
    %195 = arith.divf %193, %194 : vector<2x32xf32>
    %196 = vector.extract_strided_slice %158 {offsets = [0, 64], sizes = [2, 32], strides = [1, 1]} : vector<2x128xf32> to vector<2x32xf32>
    %197 = math.tanh %196 : vector<2x32xf32>
    %198 = vector.extract_strided_slice %158 {offsets = [0, 96], sizes = [2, 32], strides = [1, 1]} : vector<2x128xf32> to vector<2x32xf32>
    %199 = arith.negf %198 : vector<2x32xf32>
    %200 = math.exp %199 : vector<2x32xf32>
    %cst_55 = arith.constant 1.000000e+00 : f32
    %201 = vector.broadcast %cst_55 : f32 to vector<2x32xf32>
    %202 = arith.addf %201, %200 : vector<2x32xf32>
    %203 = arith.divf %201, %202 : vector<2x32xf32>
    %204 = arith.mulf %195, %137 : vector<2x32xf32>
    %205 = arith.mulf %189, %197 : vector<2x32xf32>
    %206 = arith.addf %204, %205 : vector<2x32xf32>
    %207 = math.tanh %206 : vector<2x32xf32>
    %208 = arith.mulf %203, %207 : vector<2x32xf32>
    %209 = arith.index_cast %c2_i32_42 : i32 to index
    %c0_56 = arith.constant 0 : index
    %c0_57 = arith.constant 0 : index
    %210 = vector.load %arg6[%209, %c0_56, %c0_57] : memref<8x2x64xf32, #tpu.memory_space<vmem>>, vector<1x2x32xf32>
    %211 = vector.shape_cast %210 : vector<1x2x32xf32> to vector<2x32xf32>
    %212 = vector.shape_cast %183 : vector<2x32xf32> to vector<1x2x32xf32>
    tpu.vector_store %arg6[%209, %c0_56, %c0_57], %212 {strides = array<i32>} : memref<8x2x64xf32, #tpu.memory_space<vmem>>, vector<1x2x32xf32>,
    %213 = arith.index_cast %148 : i32 to index
    %c0_58 = arith.constant 0 : index
    %c32_59 = arith.constant 32 : index
    %214 = vector.load %arg6[%213, %c0_58, %c32_59] : memref<8x2x64xf32, #tpu.memory_space<vmem>>, vector<1x2x32xf32>
    %215 = vector.shape_cast %214 : vector<1x2x32xf32> to vector<2x32xf32>
    %216 = vector.shape_cast %208 : vector<2x32xf32> to vector<1x2x32xf32>
    tpu.vector_store %arg6[%213, %c0_58, %c32_59], %216 {strides = array<i32>} : memref<8x2x64xf32, #tpu.memory_space<vmem>>, vector<1x2x32xf32>,
    %c3_i32 = arith.constant 3 : i32
    %c7_i32_60 = arith.constant 7 : i32
    %217 = arith.subi %c7_i32_60, %c3_i32 : i32
    %c2_i32_61 = arith.constant 2 : i32
    %218 = arith.muli %c3_i32, %c2_i32_61 : i32
    %219 = arith.index_cast %218 : i32 to index
    %c0_62 = arith.constant 0 : index
    %220 = vector.load %arg7[%219, %c0_62] : memref<16x256xf32, #tpu.memory_space<vmem>>, vector<2x128xf32>
    %cst_63 = arith.constant dense<0.000000e+00> : vector<2x128xf32>
    %221 = tpu.matmul %183, %7, %cst_63 {dimension_numbers = #tpu.dot_dimension_numbers<[1], [0], [0], [1], [0, 0, 1, 1], [], []>} : vector<2x32xf32>, vector<32x128xf32>, vector<2x128xf32> -> vector<2x128xf32>
    %222 = arith.addf %220, %221 : vector<2x128xf32>
    %c2_i32_64 = arith.constant 2 : i32
    %223 = arith.muli %217, %c2_i32_64 : i32
    %224 = arith.index_cast %223 : i32 to index
    %c128_65 = arith.constant 128 : index
    %225 = vector.load %arg7[%224, %c128_65] : memref<16x256xf32, #tpu.memory_space<vmem>>, vector<2x128xf32>
    %cst_66 = arith.constant dense<0.000000e+00> : vector<2x128xf32>
    %226 = tpu.matmul %208, %8, %cst_66 {dimension_numbers = #tpu.dot_dimension_numbers<[1], [0], [0], [1], [0, 0, 1, 1], [], []>} : vector<2x32xf32>, vector<32x128xf32>, vector<2x128xf32> -> vector<2x128xf32>
    %227 = arith.addf %225, %226 : vector<2x128xf32>
    %228 = vector.extract_strided_slice %222 {offsets = [0, 0], sizes = [2, 32], strides = [1, 1]} : vector<2x128xf32> to vector<2x32xf32>
    %229 = arith.negf %228 : vector<2x32xf32>
    %230 = math.exp %229 : vector<2x32xf32>
    %cst_67 = arith.constant 1.000000e+00 : f32
    %231 = vector.broadcast %cst_67 : f32 to vector<2x32xf32>
    %232 = arith.addf %231, %230 : vector<2x32xf32>
    %233 = arith.divf %231, %232 : vector<2x32xf32>
    %234 = vector.extract_strided_slice %222 {offsets = [0, 32], sizes = [2, 32], strides = [1, 1]} : vector<2x128xf32> to vector<2x32xf32>
    %235 = arith.negf %234 : vector<2x32xf32>
    %236 = math.exp %235 : vector<2x32xf32>
    %cst_68 = arith.constant 1.000000e+00 : f32
    %237 = vector.broadcast %cst_68 : f32 to vector<2x32xf32>
    %238 = arith.addf %237, %236 : vector<2x32xf32>
    %239 = arith.divf %237, %238 : vector<2x32xf32>
    %240 = vector.extract_strided_slice %222 {offsets = [0, 64], sizes = [2, 32], strides = [1, 1]} : vector<2x128xf32> to vector<2x32xf32>
    %241 = math.tanh %240 : vector<2x32xf32>
    %242 = vector.extract_strided_slice %222 {offsets = [0, 96], sizes = [2, 32], strides = [1, 1]} : vector<2x128xf32> to vector<2x32xf32>
    %243 = arith.negf %242 : vector<2x32xf32>
    %244 = math.exp %243 : vector<2x32xf32>
    %cst_69 = arith.constant 1.000000e+00 : f32
    %245 = vector.broadcast %cst_69 : f32 to vector<2x32xf32>
    %246 = arith.addf %245, %244 : vector<2x32xf32>
    %247 = arith.divf %245, %246 : vector<2x32xf32>
    %248 = arith.mulf %239, %181 : vector<2x32xf32>
    %249 = arith.mulf %233, %241 : vector<2x32xf32>
    %250 = arith.addf %248, %249 : vector<2x32xf32>
    %251 = math.tanh %250 : vector<2x32xf32>
    %252 = arith.mulf %247, %251 : vector<2x32xf32>
    %253 = vector.extract_strided_slice %227 {offsets = [0, 0], sizes = [2, 32], strides = [1, 1]} : vector<2x128xf32> to vector<2x32xf32>
    %254 = arith.negf %253 : vector<2x32xf32>
    %255 = math.exp %254 : vector<2x32xf32>
    %cst_70 = arith.constant 1.000000e+00 : f32
    %256 = vector.broadcast %cst_70 : f32 to vector<2x32xf32>
    %257 = arith.addf %256, %255 : vector<2x32xf32>
    %258 = arith.divf %256, %257 : vector<2x32xf32>
    %259 = vector.extract_strided_slice %227 {offsets = [0, 32], sizes = [2, 32], strides = [1, 1]} : vector<2x128xf32> to vector<2x32xf32>
    %260 = arith.negf %259 : vector<2x32xf32>
    %261 = math.exp %260 : vector<2x32xf32>
    %cst_71 = arith.constant 1.000000e+00 : f32
    %262 = vector.broadcast %cst_71 : f32 to vector<2x32xf32>
    %263 = arith.addf %262, %261 : vector<2x32xf32>
    %264 = arith.divf %262, %263 : vector<2x32xf32>
    %265 = vector.extract_strided_slice %227 {offsets = [0, 64], sizes = [2, 32], strides = [1, 1]} : vector<2x128xf32> to vector<2x32xf32>
    %266 = math.tanh %265 : vector<2x32xf32>
    %267 = vector.extract_strided_slice %227 {offsets = [0, 96], sizes = [2, 32], strides = [1, 1]} : vector<2x128xf32> to vector<2x32xf32>
    %268 = arith.negf %267 : vector<2x32xf32>
    %269 = math.exp %268 : vector<2x32xf32>
    %cst_72 = arith.constant 1.000000e+00 : f32
    %270 = vector.broadcast %cst_72 : f32 to vector<2x32xf32>
    %271 = arith.addf %270, %269 : vector<2x32xf32>
    %272 = arith.divf %270, %271 : vector<2x32xf32>
    %273 = arith.mulf %264, %206 : vector<2x32xf32>
    %274 = arith.mulf %258, %266 : vector<2x32xf32>
    %275 = arith.addf %273, %274 : vector<2x32xf32>
    %276 = math.tanh %275 : vector<2x32xf32>
    %277 = arith.mulf %272, %276 : vector<2x32xf32>
    %278 = arith.index_cast %c3_i32 : i32 to index
    %c0_73 = arith.constant 0 : index
    %c0_74 = arith.constant 0 : index
    %279 = vector.load %arg6[%278, %c0_73, %c0_74] : memref<8x2x64xf32, #tpu.memory_space<vmem>>, vector<1x2x32xf32>
    %280 = vector.shape_cast %279 : vector<1x2x32xf32> to vector<2x32xf32>
    %281 = vector.shape_cast %252 : vector<2x32xf32> to vector<1x2x32xf32>
    tpu.vector_store %arg6[%278, %c0_73, %c0_74], %281 {strides = array<i32>} : memref<8x2x64xf32, #tpu.memory_space<vmem>>, vector<1x2x32xf32>,
    %282 = arith.index_cast %217 : i32 to index
    %c0_75 = arith.constant 0 : index
    %c32_76 = arith.constant 32 : index
    %283 = vector.load %arg6[%282, %c0_75, %c32_76] : memref<8x2x64xf32, #tpu.memory_space<vmem>>, vector<1x2x32xf32>
    %284 = vector.shape_cast %283 : vector<1x2x32xf32> to vector<2x32xf32>
    %285 = vector.shape_cast %277 : vector<2x32xf32> to vector<1x2x32xf32>
    tpu.vector_store %arg6[%282, %c0_75, %c32_76], %285 {strides = array<i32>} : memref<8x2x64xf32, #tpu.memory_space<vmem>>, vector<1x2x32xf32>,
    %c4_i32 = arith.constant 4 : i32
    %c7_i32_77 = arith.constant 7 : i32
    %286 = arith.subi %c7_i32_77, %c4_i32 : i32
    %c2_i32_78 = arith.constant 2 : i32
    %287 = arith.muli %c4_i32, %c2_i32_78 : i32
    %288 = arith.index_cast %287 : i32 to index
    %c0_79 = arith.constant 0 : index
    %289 = vector.load %arg7[%288, %c0_79] : memref<16x256xf32, #tpu.memory_space<vmem>>, vector<2x128xf32>
    %cst_80 = arith.constant dense<0.000000e+00> : vector<2x128xf32>
    %290 = tpu.matmul %252, %7, %cst_80 {dimension_numbers = #tpu.dot_dimension_numbers<[1], [0], [0], [1], [0, 0, 1, 1], [], []>} : vector<2x32xf32>, vector<32x128xf32>, vector<2x128xf32> -> vector<2x128xf32>
    %291 = arith.addf %289, %290 : vector<2x128xf32>
    %c2_i32_81 = arith.constant 2 : i32
    %292 = arith.muli %286, %c2_i32_81 : i32
    %293 = arith.index_cast %292 : i32 to index
    %c128_82 = arith.constant 128 : index
    %294 = vector.load %arg7[%293, %c128_82] : memref<16x256xf32, #tpu.memory_space<vmem>>, vector<2x128xf32>
    %cst_83 = arith.constant dense<0.000000e+00> : vector<2x128xf32>
    %295 = tpu.matmul %277, %8, %cst_83 {dimension_numbers = #tpu.dot_dimension_numbers<[1], [0], [0], [1], [0, 0, 1, 1], [], []>} : vector<2x32xf32>, vector<32x128xf32>, vector<2x128xf32> -> vector<2x128xf32>
    %296 = arith.addf %294, %295 : vector<2x128xf32>
    %297 = vector.extract_strided_slice %291 {offsets = [0, 0], sizes = [2, 32], strides = [1, 1]} : vector<2x128xf32> to vector<2x32xf32>
    %298 = arith.negf %297 : vector<2x32xf32>
    %299 = math.exp %298 : vector<2x32xf32>
    %cst_84 = arith.constant 1.000000e+00 : f32
    %300 = vector.broadcast %cst_84 : f32 to vector<2x32xf32>
    %301 = arith.addf %300, %299 : vector<2x32xf32>
    %302 = arith.divf %300, %301 : vector<2x32xf32>
    %303 = vector.extract_strided_slice %291 {offsets = [0, 32], sizes = [2, 32], strides = [1, 1]} : vector<2x128xf32> to vector<2x32xf32>
    %304 = arith.negf %303 : vector<2x32xf32>
    %305 = math.exp %304 : vector<2x32xf32>
    %cst_85 = arith.constant 1.000000e+00 : f32
    %306 = vector.broadcast %cst_85 : f32 to vector<2x32xf32>
    %307 = arith.addf %306, %305 : vector<2x32xf32>
    %308 = arith.divf %306, %307 : vector<2x32xf32>
    %309 = vector.extract_strided_slice %291 {offsets = [0, 64], sizes = [2, 32], strides = [1, 1]} : vector<2x128xf32> to vector<2x32xf32>
    %310 = math.tanh %309 : vector<2x32xf32>
    %311 = vector.extract_strided_slice %291 {offsets = [0, 96], sizes = [2, 32], strides = [1, 1]} : vector<2x128xf32> to vector<2x32xf32>
    %312 = arith.negf %311 : vector<2x32xf32>
    %313 = math.exp %312 : vector<2x32xf32>
    %cst_86 = arith.constant 1.000000e+00 : f32
    %314 = vector.broadcast %cst_86 : f32 to vector<2x32xf32>
    %315 = arith.addf %314, %313 : vector<2x32xf32>
    %316 = arith.divf %314, %315 : vector<2x32xf32>
    %317 = arith.mulf %308, %250 : vector<2x32xf32>
    %318 = arith.mulf %302, %310 : vector<2x32xf32>
    %319 = arith.addf %317, %318 : vector<2x32xf32>
    %320 = math.tanh %319 : vector<2x32xf32>
    %321 = arith.mulf %316, %320 : vector<2x32xf32>
    %322 = vector.extract_strided_slice %296 {offsets = [0, 0], sizes = [2, 32], strides = [1, 1]} : vector<2x128xf32> to vector<2x32xf32>
    %323 = arith.negf %322 : vector<2x32xf32>
    %324 = math.exp %323 : vector<2x32xf32>
    %cst_87 = arith.constant 1.000000e+00 : f32
    %325 = vector.broadcast %cst_87 : f32 to vector<2x32xf32>
    %326 = arith.addf %325, %324 : vector<2x32xf32>
    %327 = arith.divf %325, %326 : vector<2x32xf32>
    %328 = vector.extract_strided_slice %296 {offsets = [0, 32], sizes = [2, 32], strides = [1, 1]} : vector<2x128xf32> to vector<2x32xf32>
    %329 = arith.negf %328 : vector<2x32xf32>
    %330 = math.exp %329 : vector<2x32xf32>
    %cst_88 = arith.constant 1.000000e+00 : f32
    %331 = vector.broadcast %cst_88 : f32 to vector<2x32xf32>
    %332 = arith.addf %331, %330 : vector<2x32xf32>
    %333 = arith.divf %331, %332 : vector<2x32xf32>
    %334 = vector.extract_strided_slice %296 {offsets = [0, 64], sizes = [2, 32], strides = [1, 1]} : vector<2x128xf32> to vector<2x32xf32>
    %335 = math.tanh %334 : vector<2x32xf32>
    %336 = vector.extract_strided_slice %296 {offsets = [0, 96], sizes = [2, 32], strides = [1, 1]} : vector<2x128xf32> to vector<2x32xf32>
    %337 = arith.negf %336 : vector<2x32xf32>
    %338 = math.exp %337 : vector<2x32xf32>
    %cst_89 = arith.constant 1.000000e+00 : f32
    %339 = vector.broadcast %cst_89 : f32 to vector<2x32xf32>
    %340 = arith.addf %339, %338 : vector<2x32xf32>
    %341 = arith.divf %339, %340 : vector<2x32xf32>
    %342 = arith.mulf %333, %275 : vector<2x32xf32>
    %343 = arith.mulf %327, %335 : vector<2x32xf32>
    %344 = arith.addf %342, %343 : vector<2x32xf32>
    %345 = math.tanh %344 : vector<2x32xf32>
    %346 = arith.mulf %341, %345 : vector<2x32xf32>
    %347 = arith.index_cast %c4_i32 : i32 to index
    %c0_90 = arith.constant 0 : index
    %c0_91 = arith.constant 0 : index
    %348 = vector.load %arg6[%347, %c0_90, %c0_91] : memref<8x2x64xf32, #tpu.memory_space<vmem>>, vector<1x2x32xf32>
    %349 = vector.shape_cast %348 : vector<1x2x32xf32> to vector<2x32xf32>
    %350 = vector.shape_cast %321 : vector<2x32xf32> to vector<1x2x32xf32>
    tpu.vector_store %arg6[%347, %c0_90, %c0_91], %350 {strides = array<i32>} : memref<8x2x64xf32, #tpu.memory_space<vmem>>, vector<1x2x32xf32>,
    %351 = arith.index_cast %286 : i32 to index
    %c0_92 = arith.constant 0 : index
    %c32_93 = arith.constant 32 : index
    %352 = vector.load %arg6[%351, %c0_92, %c32_93] : memref<8x2x64xf32, #tpu.memory_space<vmem>>, vector<1x2x32xf32>
    %353 = vector.shape_cast %352 : vector<1x2x32xf32> to vector<2x32xf32>
    %354 = vector.shape_cast %346 : vector<2x32xf32> to vector<1x2x32xf32>
    tpu.vector_store %arg6[%351, %c0_92, %c32_93], %354 {strides = array<i32>} : memref<8x2x64xf32, #tpu.memory_space<vmem>>, vector<1x2x32xf32>,
    %c5_i32 = arith.constant 5 : i32
    %c7_i32_94 = arith.constant 7 : i32
    %355 = arith.subi %c7_i32_94, %c5_i32 : i32
    %c2_i32_95 = arith.constant 2 : i32
    %356 = arith.muli %c5_i32, %c2_i32_95 : i32
    %357 = arith.index_cast %356 : i32 to index
    %c0_96 = arith.constant 0 : index
    %358 = vector.load %arg7[%357, %c0_96] : memref<16x256xf32, #tpu.memory_space<vmem>>, vector<2x128xf32>
    %cst_97 = arith.constant dense<0.000000e+00> : vector<2x128xf32>
    %359 = tpu.matmul %321, %7, %cst_97 {dimension_numbers = #tpu.dot_dimension_numbers<[1], [0], [0], [1], [0, 0, 1, 1], [], []>} : vector<2x32xf32>, vector<32x128xf32>, vector<2x128xf32> -> vector<2x128xf32>
    %360 = arith.addf %358, %359 : vector<2x128xf32>
    %c2_i32_98 = arith.constant 2 : i32
    %361 = arith.muli %355, %c2_i32_98 : i32
    %362 = arith.index_cast %361 : i32 to index
    %c128_99 = arith.constant 128 : index
    %363 = vector.load %arg7[%362, %c128_99] : memref<16x256xf32, #tpu.memory_space<vmem>>, vector<2x128xf32>
    %cst_100 = arith.constant dense<0.000000e+00> : vector<2x128xf32>
    %364 = tpu.matmul %346, %8, %cst_100 {dimension_numbers = #tpu.dot_dimension_numbers<[1], [0], [0], [1], [0, 0, 1, 1], [], []>} : vector<2x32xf32>, vector<32x128xf32>, vector<2x128xf32> -> vector<2x128xf32>
    %365 = arith.addf %363, %364 : vector<2x128xf32>
    %366 = vector.extract_strided_slice %360 {offsets = [0, 0], sizes = [2, 32], strides = [1, 1]} : vector<2x128xf32> to vector<2x32xf32>
    %367 = arith.negf %366 : vector<2x32xf32>
    %368 = math.exp %367 : vector<2x32xf32>
    %cst_101 = arith.constant 1.000000e+00 : f32
    %369 = vector.broadcast %cst_101 : f32 to vector<2x32xf32>
    %370 = arith.addf %369, %368 : vector<2x32xf32>
    %371 = arith.divf %369, %370 : vector<2x32xf32>
    %372 = vector.extract_strided_slice %360 {offsets = [0, 32], sizes = [2, 32], strides = [1, 1]} : vector<2x128xf32> to vector<2x32xf32>
    %373 = arith.negf %372 : vector<2x32xf32>
    %374 = math.exp %373 : vector<2x32xf32>
    %cst_102 = arith.constant 1.000000e+00 : f32
    %375 = vector.broadcast %cst_102 : f32 to vector<2x32xf32>
    %376 = arith.addf %375, %374 : vector<2x32xf32>
    %377 = arith.divf %375, %376 : vector<2x32xf32>
    %378 = vector.extract_strided_slice %360 {offsets = [0, 64], sizes = [2, 32], strides = [1, 1]} : vector<2x128xf32> to vector<2x32xf32>
    %379 = math.tanh %378 : vector<2x32xf32>
    %380 = vector.extract_strided_slice %360 {offsets = [0, 96], sizes = [2, 32], strides = [1, 1]} : vector<2x128xf32> to vector<2x32xf32>
    %381 = arith.negf %380 : vector<2x32xf32>
    %382 = math.exp %381 : vector<2x32xf32>
    %cst_103 = arith.constant 1.000000e+00 : f32
    %383 = vector.broadcast %cst_103 : f32 to vector<2x32xf32>
    %384 = arith.addf %383, %382 : vector<2x32xf32>
    %385 = arith.divf %383, %384 : vector<2x32xf32>
    %386 = arith.mulf %377, %319 : vector<2x32xf32>
    %387 = arith.mulf %371, %379 : vector<2x32xf32>
    %388 = arith.addf %386, %387 : vector<2x32xf32>
    %389 = math.tanh %388 : vector<2x32xf32>
    %390 = arith.mulf %385, %389 : vector<2x32xf32>
    %391 = vector.extract_strided_slice %365 {offsets = [0, 0], sizes = [2, 32], strides = [1, 1]} : vector<2x128xf32> to vector<2x32xf32>
    %392 = arith.negf %391 : vector<2x32xf32>
    %393 = math.exp %392 : vector<2x32xf32>
    %cst_104 = arith.constant 1.000000e+00 : f32
    %394 = vector.broadcast %cst_104 : f32 to vector<2x32xf32>
    %395 = arith.addf %394, %393 : vector<2x32xf32>
    %396 = arith.divf %394, %395 : vector<2x32xf32>
    %397 = vector.extract_strided_slice %365 {offsets = [0, 32], sizes = [2, 32], strides = [1, 1]} : vector<2x128xf32> to vector<2x32xf32>
    %398 = arith.negf %397 : vector<2x32xf32>
    %399 = math.exp %398 : vector<2x32xf32>
    %cst_105 = arith.constant 1.000000e+00 : f32
    %400 = vector.broadcast %cst_105 : f32 to vector<2x32xf32>
    %401 = arith.addf %400, %399 : vector<2x32xf32>
    %402 = arith.divf %400, %401 : vector<2x32xf32>
    %403 = vector.extract_strided_slice %365 {offsets = [0, 64], sizes = [2, 32], strides = [1, 1]} : vector<2x128xf32> to vector<2x32xf32>
    %404 = math.tanh %403 : vector<2x32xf32>
    %405 = vector.extract_strided_slice %365 {offsets = [0, 96], sizes = [2, 32], strides = [1, 1]} : vector<2x128xf32> to vector<2x32xf32>
    %406 = arith.negf %405 : vector<2x32xf32>
    %407 = math.exp %406 : vector<2x32xf32>
    %cst_106 = arith.constant 1.000000e+00 : f32
    %408 = vector.broadcast %cst_106 : f32 to vector<2x32xf32>
    %409 = arith.addf %408, %407 : vector<2x32xf32>
    %410 = arith.divf %408, %409 : vector<2x32xf32>
    %411 = arith.mulf %402, %344 : vector<2x32xf32>
    %412 = arith.mulf %396, %404 : vector<2x32xf32>
    %413 = arith.addf %411, %412 : vector<2x32xf32>
    %414 = math.tanh %413 : vector<2x32xf32>
    %415 = arith.mulf %410, %414 : vector<2x32xf32>
    %416 = arith.index_cast %c5_i32 : i32 to index
    %c0_107 = arith.constant 0 : index
    %c0_108 = arith.constant 0 : index
    %417 = vector.load %arg6[%416, %c0_107, %c0_108] : memref<8x2x64xf32, #tpu.memory_space<vmem>>, vector<1x2x32xf32>
    %418 = vector.shape_cast %417 : vector<1x2x32xf32> to vector<2x32xf32>
    %419 = vector.shape_cast %390 : vector<2x32xf32> to vector<1x2x32xf32>
    tpu.vector_store %arg6[%416, %c0_107, %c0_108], %419 {strides = array<i32>} : memref<8x2x64xf32, #tpu.memory_space<vmem>>, vector<1x2x32xf32>,
    %420 = arith.index_cast %355 : i32 to index
    %c0_109 = arith.constant 0 : index
    %c32_110 = arith.constant 32 : index
    %421 = vector.load %arg6[%420, %c0_109, %c32_110] : memref<8x2x64xf32, #tpu.memory_space<vmem>>, vector<1x2x32xf32>
    %422 = vector.shape_cast %421 : vector<1x2x32xf32> to vector<2x32xf32>
    %423 = vector.shape_cast %415 : vector<2x32xf32> to vector<1x2x32xf32>
    tpu.vector_store %arg6[%420, %c0_109, %c32_110], %423 {strides = array<i32>} : memref<8x2x64xf32, #tpu.memory_space<vmem>>, vector<1x2x32xf32>,
    %c6_i32 = arith.constant 6 : i32
    %c7_i32_111 = arith.constant 7 : i32
    %424 = arith.subi %c7_i32_111, %c6_i32 : i32
    %c2_i32_112 = arith.constant 2 : i32
    %425 = arith.muli %c6_i32, %c2_i32_112 : i32
    %426 = arith.index_cast %425 : i32 to index
    %c0_113 = arith.constant 0 : index
    %427 = vector.load %arg7[%426, %c0_113] : memref<16x256xf32, #tpu.memory_space<vmem>>, vector<2x128xf32>
    %cst_114 = arith.constant dense<0.000000e+00> : vector<2x128xf32>
    %428 = tpu.matmul %390, %7, %cst_114 {dimension_numbers = #tpu.dot_dimension_numbers<[1], [0], [0], [1], [0, 0, 1, 1], [], []>} : vector<2x32xf32>, vector<32x128xf32>, vector<2x128xf32> -> vector<2x128xf32>
    %429 = arith.addf %427, %428 : vector<2x128xf32>
    %c2_i32_115 = arith.constant 2 : i32
    %430 = arith.muli %424, %c2_i32_115 : i32
    %431 = arith.index_cast %430 : i32 to index
    %c128_116 = arith.constant 128 : index
    %432 = vector.load %arg7[%431, %c128_116] : memref<16x256xf32, #tpu.memory_space<vmem>>, vector<2x128xf32>
    %cst_117 = arith.constant dense<0.000000e+00> : vector<2x128xf32>
    %433 = tpu.matmul %415, %8, %cst_117 {dimension_numbers = #tpu.dot_dimension_numbers<[1], [0], [0], [1], [0, 0, 1, 1], [], []>} : vector<2x32xf32>, vector<32x128xf32>, vector<2x128xf32> -> vector<2x128xf32>
    %434 = arith.addf %432, %433 : vector<2x128xf32>
    %435 = vector.extract_strided_slice %429 {offsets = [0, 0], sizes = [2, 32], strides = [1, 1]} : vector<2x128xf32> to vector<2x32xf32>
    %436 = arith.negf %435 : vector<2x32xf32>
    %437 = math.exp %436 : vector<2x32xf32>
    %cst_118 = arith.constant 1.000000e+00 : f32
    %438 = vector.broadcast %cst_118 : f32 to vector<2x32xf32>
    %439 = arith.addf %438, %437 : vector<2x32xf32>
    %440 = arith.divf %438, %439 : vector<2x32xf32>
    %441 = vector.extract_strided_slice %429 {offsets = [0, 32], sizes = [2, 32], strides = [1, 1]} : vector<2x128xf32> to vector<2x32xf32>
    %442 = arith.negf %441 : vector<2x32xf32>
    %443 = math.exp %442 : vector<2x32xf32>
    %cst_119 = arith.constant 1.000000e+00 : f32
    %444 = vector.broadcast %cst_119 : f32 to vector<2x32xf32>
    %445 = arith.addf %444, %443 : vector<2x32xf32>
    %446 = arith.divf %444, %445 : vector<2x32xf32>
    %447 = vector.extract_strided_slice %429 {offsets = [0, 64], sizes = [2, 32], strides = [1, 1]} : vector<2x128xf32> to vector<2x32xf32>
    %448 = math.tanh %447 : vector<2x32xf32>
    %449 = vector.extract_strided_slice %429 {offsets = [0, 96], sizes = [2, 32], strides = [1, 1]} : vector<2x128xf32> to vector<2x32xf32>
    %450 = arith.negf %449 : vector<2x32xf32>
    %451 = math.exp %450 : vector<2x32xf32>
    %cst_120 = arith.constant 1.000000e+00 : f32
    %452 = vector.broadcast %cst_120 : f32 to vector<2x32xf32>
    %453 = arith.addf %452, %451 : vector<2x32xf32>
    %454 = arith.divf %452, %453 : vector<2x32xf32>
    %455 = arith.mulf %446, %388 : vector<2x32xf32>
    %456 = arith.mulf %440, %448 : vector<2x32xf32>
    %457 = arith.addf %455, %456 : vector<2x32xf32>
    %458 = math.tanh %457 : vector<2x32xf32>
    %459 = arith.mulf %454, %458 : vector<2x32xf32>
    %460 = vector.extract_strided_slice %434 {offsets = [0, 0], sizes = [2, 32], strides = [1, 1]} : vector<2x128xf32> to vector<2x32xf32>
    %461 = arith.negf %460 : vector<2x32xf32>
    %462 = math.exp %461 : vector<2x32xf32>
    %cst_121 = arith.constant 1.000000e+00 : f32
    %463 = vector.broadcast %cst_121 : f32 to vector<2x32xf32>
    %464 = arith.addf %463, %462 : vector<2x32xf32>
    %465 = arith.divf %463, %464 : vector<2x32xf32>
    %466 = vector.extract_strided_slice %434 {offsets = [0, 32], sizes = [2, 32], strides = [1, 1]} : vector<2x128xf32> to vector<2x32xf32>
    %467 = arith.negf %466 : vector<2x32xf32>
    %468 = math.exp %467 : vector<2x32xf32>
    %cst_122 = arith.constant 1.000000e+00 : f32
    %469 = vector.broadcast %cst_122 : f32 to vector<2x32xf32>
    %470 = arith.addf %469, %468 : vector<2x32xf32>
    %471 = arith.divf %469, %470 : vector<2x32xf32>
    %472 = vector.extract_strided_slice %434 {offsets = [0, 64], sizes = [2, 32], strides = [1, 1]} : vector<2x128xf32> to vector<2x32xf32>
    %473 = math.tanh %472 : vector<2x32xf32>
    %474 = vector.extract_strided_slice %434 {offsets = [0, 96], sizes = [2, 32], strides = [1, 1]} : vector<2x128xf32> to vector<2x32xf32>
    %475 = arith.negf %474 : vector<2x32xf32>
    %476 = math.exp %475 : vector<2x32xf32>
    %cst_123 = arith.constant 1.000000e+00 : f32
    %477 = vector.broadcast %cst_123 : f32 to vector<2x32xf32>
    %478 = arith.addf %477, %476 : vector<2x32xf32>
    %479 = arith.divf %477, %478 : vector<2x32xf32>
    %480 = arith.mulf %471, %413 : vector<2x32xf32>
    %481 = arith.mulf %465, %473 : vector<2x32xf32>
    %482 = arith.addf %480, %481 : vector<2x32xf32>
    %483 = math.tanh %482 : vector<2x32xf32>
    %484 = arith.mulf %479, %483 : vector<2x32xf32>
    %485 = arith.index_cast %c6_i32 : i32 to index
    %c0_124 = arith.constant 0 : index
    %c0_125 = arith.constant 0 : index
    %486 = vector.load %arg6[%485, %c0_124, %c0_125] : memref<8x2x64xf32, #tpu.memory_space<vmem>>, vector<1x2x32xf32>
    %487 = vector.shape_cast %486 : vector<1x2x32xf32> to vector<2x32xf32>
    %488 = vector.shape_cast %459 : vector<2x32xf32> to vector<1x2x32xf32>
    tpu.vector_store %arg6[%485, %c0_124, %c0_125], %488 {strides = array<i32>} : memref<8x2x64xf32, #tpu.memory_space<vmem>>, vector<1x2x32xf32>,
    %489 = arith.index_cast %424 : i32 to index
    %c0_126 = arith.constant 0 : index
    %c32_127 = arith.constant 32 : index
    %490 = vector.load %arg6[%489, %c0_126, %c32_127] : memref<8x2x64xf32, #tpu.memory_space<vmem>>, vector<1x2x32xf32>
    %491 = vector.shape_cast %490 : vector<1x2x32xf32> to vector<2x32xf32>
    %492 = vector.shape_cast %484 : vector<2x32xf32> to vector<1x2x32xf32>
    tpu.vector_store %arg6[%489, %c0_126, %c32_127], %492 {strides = array<i32>} : memref<8x2x64xf32, #tpu.memory_space<vmem>>, vector<1x2x32xf32>,
    %c7_i32_128 = arith.constant 7 : i32
    %c7_i32_129 = arith.constant 7 : i32
    %493 = arith.subi %c7_i32_129, %c7_i32_128 : i32
    %c2_i32_130 = arith.constant 2 : i32
    %494 = arith.muli %c7_i32_128, %c2_i32_130 : i32
    %495 = arith.index_cast %494 : i32 to index
    %c0_131 = arith.constant 0 : index
    %496 = vector.load %arg7[%495, %c0_131] : memref<16x256xf32, #tpu.memory_space<vmem>>, vector<2x128xf32>
    %cst_132 = arith.constant dense<0.000000e+00> : vector<2x128xf32>
    %497 = tpu.matmul %459, %7, %cst_132 {dimension_numbers = #tpu.dot_dimension_numbers<[1], [0], [0], [1], [0, 0, 1, 1], [], []>} : vector<2x32xf32>, vector<32x128xf32>, vector<2x128xf32> -> vector<2x128xf32>
    %498 = arith.addf %496, %497 : vector<2x128xf32>
    %c2_i32_133 = arith.constant 2 : i32
    %499 = arith.muli %493, %c2_i32_133 : i32
    %500 = arith.index_cast %499 : i32 to index
    %c128_134 = arith.constant 128 : index
    %501 = vector.load %arg7[%500, %c128_134] : memref<16x256xf32, #tpu.memory_space<vmem>>, vector<2x128xf32>
    %cst_135 = arith.constant dense<0.000000e+00> : vector<2x128xf32>
    %502 = tpu.matmul %484, %8, %cst_135 {dimension_numbers = #tpu.dot_dimension_numbers<[1], [0], [0], [1], [0, 0, 1, 1], [], []>} : vector<2x32xf32>, vector<32x128xf32>, vector<2x128xf32> -> vector<2x128xf32>
    %503 = arith.addf %501, %502 : vector<2x128xf32>
    %504 = vector.extract_strided_slice %498 {offsets = [0, 0], sizes = [2, 32], strides = [1, 1]} : vector<2x128xf32> to vector<2x32xf32>
    %505 = arith.negf %504 : vector<2x32xf32>
    %506 = math.exp %505 : vector<2x32xf32>
    %cst_136 = arith.constant 1.000000e+00 : f32
    %507 = vector.broadcast %cst_136 : f32 to vector<2x32xf32>
    %508 = arith.addf %507, %506 : vector<2x32xf32>
    %509 = arith.divf %507, %508 : vector<2x32xf32>
    %510 = vector.extract_strided_slice %498 {offsets = [0, 32], sizes = [2, 32], strides = [1, 1]} : vector<2x128xf32> to vector<2x32xf32>
    %511 = arith.negf %510 : vector<2x32xf32>
    %512 = math.exp %511 : vector<2x32xf32>
    %cst_137 = arith.constant 1.000000e+00 : f32
    %513 = vector.broadcast %cst_137 : f32 to vector<2x32xf32>
    %514 = arith.addf %513, %512 : vector<2x32xf32>
    %515 = arith.divf %513, %514 : vector<2x32xf32>
    %516 = vector.extract_strided_slice %498 {offsets = [0, 64], sizes = [2, 32], strides = [1, 1]} : vector<2x128xf32> to vector<2x32xf32>
    %517 = math.tanh %516 : vector<2x32xf32>
    %518 = vector.extract_strided_slice %498 {offsets = [0, 96], sizes = [2, 32], strides = [1, 1]} : vector<2x128xf32> to vector<2x32xf32>
    %519 = arith.negf %518 : vector<2x32xf32>
    %520 = math.exp %519 : vector<2x32xf32>
    %cst_138 = arith.constant 1.000000e+00 : f32
    %521 = vector.broadcast %cst_138 : f32 to vector<2x32xf32>
    %522 = arith.addf %521, %520 : vector<2x32xf32>
    %523 = arith.divf %521, %522 : vector<2x32xf32>
    %524 = arith.mulf %515, %457 : vector<2x32xf32>
    %525 = arith.mulf %509, %517 : vector<2x32xf32>
    %526 = arith.addf %524, %525 : vector<2x32xf32>
    %527 = math.tanh %526 : vector<2x32xf32>
    %528 = arith.mulf %523, %527 : vector<2x32xf32>
    %529 = vector.extract_strided_slice %503 {offsets = [0, 0], sizes = [2, 32], strides = [1, 1]} : vector<2x128xf32> to vector<2x32xf32>
    %530 = arith.negf %529 : vector<2x32xf32>
    %531 = math.exp %530 : vector<2x32xf32>
    %cst_139 = arith.constant 1.000000e+00 : f32
    %532 = vector.broadcast %cst_139 : f32 to vector<2x32xf32>
    %533 = arith.addf %532, %531 : vector<2x32xf32>
    %534 = arith.divf %532, %533 : vector<2x32xf32>
    %535 = vector.extract_strided_slice %503 {offsets = [0, 32], sizes = [2, 32], strides = [1, 1]} : vector<2x128xf32> to vector<2x32xf32>
    %536 = arith.negf %535 : vector<2x32xf32>
    %537 = math.exp %536 : vector<2x32xf32>
    %cst_140 = arith.constant 1.000000e+00 : f32
    %538 = vector.broadcast %cst_140 : f32 to vector<2x32xf32>
    %539 = arith.addf %538, %537 : vector<2x32xf32>
    %540 = arith.divf %538, %539 : vector<2x32xf32>
    %541 = vector.extract_strided_slice %503 {offsets = [0, 64], sizes = [2, 32], strides = [1, 1]} : vector<2x128xf32> to vector<2x32xf32>
    %542 = math.tanh %541 : vector<2x32xf32>
    %543 = vector.extract_strided_slice %503 {offsets = [0, 96], sizes = [2, 32], strides = [1, 1]} : vector<2x128xf32> to vector<2x32xf32>
    %544 = arith.negf %543 : vector<2x32xf32>
    %545 = math.exp %544 : vector<2x32xf32>
    %cst_141 = arith.constant 1.000000e+00 : f32
    %546 = vector.broadcast %cst_141 : f32 to vector<2x32xf32>
    %547 = arith.addf %546, %545 : vector<2x32xf32>
    %548 = arith.divf %546, %547 : vector<2x32xf32>
    %549 = arith.mulf %540, %482 : vector<2x32xf32>
    %550 = arith.mulf %534, %542 : vector<2x32xf32>
    %551 = arith.addf %549, %550 : vector<2x32xf32>
    %552 = math.tanh %551 : vector<2x32xf32>
    %553 = arith.mulf %548, %552 : vector<2x32xf32>
    %554 = arith.index_cast %c7_i32_128 : i32 to index
    %c0_142 = arith.constant 0 : index
    %c0_143 = arith.constant 0 : index
    %555 = vector.load %arg6[%554, %c0_142, %c0_143] : memref<8x2x64xf32, #tpu.memory_space<vmem>>, vector<1x2x32xf32>
    %556 = vector.shape_cast %555 : vector<1x2x32xf32> to vector<2x32xf32>
    %557 = vector.shape_cast %528 : vector<2x32xf32> to vector<1x2x32xf32>
    tpu.vector_store %arg6[%554, %c0_142, %c0_143], %557 {strides = array<i32>} : memref<8x2x64xf32, #tpu.memory_space<vmem>>, vector<1x2x32xf32>,
    %558 = arith.index_cast %493 : i32 to index
    %c0_144 = arith.constant 0 : index
    %c32_145 = arith.constant 32 : index
    %559 = vector.load %arg6[%558, %c0_144, %c32_145] : memref<8x2x64xf32, #tpu.memory_space<vmem>>, vector<1x2x32xf32>
    %560 = vector.shape_cast %559 : vector<1x2x32xf32> to vector<2x32xf32>
    %561 = vector.shape_cast %553 : vector<2x32xf32> to vector<1x2x32xf32>
    tpu.vector_store %arg6[%558, %c0_144, %c32_145], %561 {strides = array<i32>} : memref<8x2x64xf32, #tpu.memory_space<vmem>>, vector<1x2x32xf32>,
    %c8_i32 = arith.constant 8 : i32
    return
  }
  func.func @transform_0(%arg0: i32) -> (i32, i32) {
    %c0_i32 = arith.constant 0 : i32
    %c0_i32_0 = arith.constant 0 : i32
    %c0_i32_1 = arith.constant 0 : i32
    return %c0_i32, %c0_i32_0 : i32, i32
  }
  func.func @transform_1(%arg0: i32) -> (i32, i32) {
    %c0_i32 = arith.constant 0 : i32
    %c0_i32_0 = arith.constant 0 : i32
    %c0_i32_1 = arith.constant 0 : i32
    return %c0_i32, %c0_i32_0 : i32, i32
  }
  func.func @transform_2(%arg0: i32) -> (i32, i32) {
    %c0_i32 = arith.constant 0 : i32
    %c0_i32_0 = arith.constant 0 : i32
    %c0_i32_1 = arith.constant 0 : i32
    return %c0_i32, %c0_i32_0 : i32, i32
  }
  func.func @transform_3(%arg0: i32) -> (i32, i32) {
    %c0_i32 = arith.constant 0 : i32
    %c0_i32_0 = arith.constant 0 : i32
    %c0_i32_1 = arith.constant 0 : i32
    return %c0_i32, %c0_i32_0 : i32, i32
  }
  func.func @transform_4(%arg0: i32) -> (i32, i32) {
    %c0_i32 = arith.constant 0 : i32
    %c0_i32_0 = arith.constant 0 : i32
    %c0_i32_1 = arith.constant 0 : i32
    return %c0_i32, %c0_i32_0 : i32, i32
  }
  func.func @transform_5(%arg0: i32) -> (i32, i32, i32) {
    %c0_i32 = arith.constant 0 : i32
    %c0_i32_0 = arith.constant 0 : i32
    %c0_i32_1 = arith.constant 0 : i32
    %c0_i32_2 = arith.constant 0 : i32
    return %c0_i32, %c0_i32_0, %c0_i32_1 : i32, i32, i32
  }
}

</mosaic_0001>

<bundles_post_ra>
// kernel: tpu_custom_call.1
= control target key start
LH: loop header
LB: loop body
LE: loop exit
PB: predicated region body
PF: predicated region fallthrough
CT: control target
= control target key end

     0   :  { %10 = vsyncpa [#allocation4], 0  ;;  %s2978_s0 = inlined_call_operand.hbm [shape: f32[16,32], index: 0, kind: input, shape index: {}]   ;;  %s2979_s1 = inlined_call_operand.hbm [shape: f32[32,256], index: 1, kind: input, shape index: {}]   ;;  %s2980_s2 = inlined_call_operand.hbm [shape: f32[32,128], index: 2, kind: input, shape index: {}]   ;;  %s2981_s3 = inlined_call_operand.hbm [shape: f32[32,128], index: 3, kind: input, shape index: {}]   ;;  %s2982_s4 = inlined_call_operand.vmem [shape: f32[1,256], index: 4, kind: input, shape index: {}]   ;;  %s2983_s5 = inlined_call_operand.hbm [shape: f32[8,2,64], index: 5, kind: output, shape index: {}]  }
   0x1   :  { %11 = vsyncpa [#allocation7], 0 }
   0x2   :  { %12 = vsyncpa [#allocation10], 0 }
   0x3   :  { %13 = vsyncpa [#allocation5], 0  ;;  %s2531_s18 = smov [#allocation6]  }
   0x4   :  { %s31_s19 = sshll.u32 %s2531_s18, 4  ;;  %s32_s19 = int_to_ptr.vmem [resolvable:$true] %s31_s19 }
   0x5   :  { %s2431_s20 = scalar_lea.vmem %s32_s19, 1024  ;;  %p2436_p1 = scmp.lt.s32.totalorder %s32_s19, %s32_s19 }
   0x6   :  { %p2432_p0 = scmp.ne.s32.totalorder %s32_s19, %s2431_s20  ;;  %p2437_p2 = scmp.lt.s32.totalorder %s2431_s20, %s2431_s20 }
   0x8   :  { %p2438_p3 = por %p2437_p2, %p2436_p1 }
   0xa   :  { %p2439_p4 = pnand %p2438_p3, %p2432_p0 }
   0xc   :  { %2442 = shalt.err (!%p2439_p4)
}
   0xd   :  { %s2532_s21 = smov 256   ;;  %s2533_s22 = smov 16  }
   0xe   :  { %37 = dma.hbm_to_vmem [thread:$0]  %s2979_s1, 1024, %s32_s19, [#allocation7], %s2532_s21, %s2532_s21, %s2533_s22  }
   0xf   :  { %s2534_s25 = smov [#allocation3]  }
  0x10   :  { %s19_s26 = sshll.u32 %s2534_s25, 4  ;;  %s20_s26 = int_to_ptr.vmem [resolvable:$true] %s19_s26 }
  0x11   :  { %s2451_s27 = scalar_lea.vmem %s20_s26, 256  ;;  %p2456_p6 = scmp.lt.s32.totalorder %s20_s26, %s20_s26 }
  0x12   :  { %p2452_p5 = scmp.ne.s32.totalorder %s20_s26, %s2451_s27  ;;  %p2457_p7 = scmp.lt.s32.totalorder %s2451_s27, %s2451_s27 }
  0x14   :  { %p2458_p8 = por %p2457_p7, %p2456_p6 }
  0x16   :  { %p2459_p9 = pnand %p2458_p8, %p2452_p5 }
  0x18   :  { %2462 = shalt.err (!%p2459_p9)
}
  0x19   :  { %s2535_s28 = smov 128   ;;  %s2536_s29 = smov 8  }
  0x1a   :  { %25 = dma.hbm_to_vmem [thread:$0]  %s2978_s0, 256, %s20_s26, [#allocation4], %s2535_s28, %s2535_s28, %s2536_s29  }
  0x1b   :  { %s2537_s7 = smov [#allocation8]   ;;  %s2538_s9 = smov [#allocation9]  }
  0x1c   :  { %s43_s8 = sshll.u32 %s2537_s7, 4  ;;  %s55_s1 = sshll.u32 %s2538_s9, 4  ;;  %s44_s8 = int_to_ptr.vmem [resolvable:$true] %s43_s8  ;;  %s56_s1 = int_to_ptr.vmem [resolvable:$true] %s55_s1 }
  0x1d   :  { %s2471_s10 = scalar_lea.vmem %s44_s8, 512  ;;  %p2476_p11 = scmp.lt.s32.totalorder %s44_s8, %s44_s8 }
  0x1e   :  { %p2472_p10 = scmp.ne.s32.totalorder %s44_s8, %s2471_s10  ;;  %p2477_p12 = scmp.lt.s32.totalorder %s2471_s10, %s2471_s10 }
  0x20   :  { %p2478_p13 = por %p2477_p12, %p2476_p11 }
  0x22   :  { %p2479_p0 = pnand %p2478_p13, %p2472_p10 }
  0x24   :  { %2482 = shalt.err (!%p2479_p0)
}
  0x25   :  { %49 = dma.hbm_to_vmem [thread:$0]  %s2980_s2, 512, %s44_s8, [#allocation7], %s2535_s28, %s2535_s28, %s2536_s29  }
  0x26   :  { %s2491_s13 = scalar_lea.vmem %s56_s1, 512  ;;  %p2496_p2 = scmp.lt.s32.totalorder %s56_s1, %s56_s1 }
  0x27   :  { %p2492_p1 = scmp.ne.s32.totalorder %s56_s1, %s2491_s13  ;;  %p2497_p3 = scmp.lt.s32.totalorder %s2491_s13, %s2491_s13 }
  0x29   :  { %p2498_p4 = por %p2497_p3, %p2496_p2 }
  0x2b   :  { %p2499_p5 = pnand %p2498_p4, %p2492_p1 }
  0x2d   :  { %2502 = shalt.err (!%p2499_p5)
}
  0x2e   :  { %61 = dma.hbm_to_vmem [thread:$0]  %s2981_s3, 512, %s56_s1, [#allocation10], %s2535_s28, %s2535_s28, %s2536_s29  }
  0x2f   :  { %2523 = dma.done.wait [#allocation4], 256  }
  0x30   :  { %2524 = vsyncadd [#allocation4], 4294967040 }
  0x31   :  { %2525 = dma.done.wait [#allocation7], 1536  }
  0x32   :  { %2526 = vsyncadd [#allocation7], 4294965760 }
  0x33   :  { %2527 = dma.done.wait [#allocation10], 512  }
  0x34   :  { %2528 = vsyncadd [#allocation10], 4294966784  ;;  %v2539_v0 = vmov 0.0   ;;  %vm2540_vm0 = vmmov 0   ;;  %v85_v1 = vld [vmem:[#allocation6 + $0x38] sm:$0xff]  ;;  %v84_v2 = vld [vmem:[#allocation6 + $0x30] sm:$0xff]  ;;  %v88_v19 = vlaneseq }
  0x35   :  { %169 = vmatprep.mubr.f32.mxu0 %v2539_v0  ;;  %2100 = vmatprep.subr.mxu1 %v2539_v0  ;;  %v83_v3 = vld [vmem:[#allocation6 + $0x28] sm:$0xff]  ;;  %v82_v4 = vld [vmem:[#allocation6 + $0x20] sm:$0xff]  ;;  %v81_v5 = vld [vmem:[#allocation6 + $0x18] sm:$0xff]  ;;  %vm98_vm1 = vcmask 261120   ;;  %s2542_s15 = smov 32   ;;  %vm396_vm2 = vcmask 254976  }
  0x36   :  { %2108 = vmatprep.mubr.msk.f32.mxu1 %vm2540_vm0, %v2539_v0  ;;  %129 = vmatprep.subr.mxu0 %v85_v1  ;;  %v80_v6 = vld [vmem:[#allocation6 + $0x10] sm:$0xff]  ;;  %v2591_v7 = vld [vmem:[#allocation8 + $0x18] sm:$0xff]  ;;  %v79_v9 = vld [vmem:[#allocation6 + $0x8] sm:$0xff]  ;;  %v89_v20 = vshrl.u32 %v88_v19, 7  ;;  %vm403_vm3 = vcmask 523526   ;;  %vm628_vm4 = vcmask 521476  }
  0x37   :  { %130 = vmatpush1.msra.mxu0 %v84_v2  ;;  %v2593_v8 = vld [vmem:[#allocation8 + $0x10] sm:$0xff]  ;;  %2101 = vmatpush3.msra.mxu1 %v2591_v7  ;;  %v78_v10 = vld [vmem:[#allocation6] sm:$0xff]  ;;  %v2597_v11 = vld [vmem:[#allocation8 + $0x8] sm:$0xff]  ;;  %vm621_vm5 = vcmask 257026   ;;  %vm856_vm6 = vcmask 519426   ;;  %vm849_vm7 = vcmask 259076  }
  0x38   :  { %131 = vmatprep.subr.mxu0 %v83_v3  ;;  %2102 = vmatprep.subr.mxu1 %v2539_v0  ;;  %v76_v12 = vld [vmem:[#allocation3] sm:$0xff]  ;;  %v2600_v13 = vld [vmem:[#allocation9 + $0x18] sm:$0xff]  ;;  %v2608_v15 = vld [vmem:[#allocation8] sm:$0xff]  ;;  %v90_v21 = vsub.s32 0, %v89_v20  ;;  %v94_v23 = vsub.s32 1, %v89_v20  ;;  %vm1081_vm8 = vcmask 517376  }
  0x39   :  { %132 = vmatpush1.msra.mxu0 %v82_v4  ;;  %2103 = vmatpush3.msra.mxu1 %v2593_v8  ;;  %v2606_v14 = vld [vmem:[#allocation9 + $0x10] sm:$0xff]  ;;  %v77_v16 = vld [vmem:[#allocation3 + $0x8] sm:$0xff]  ;;  %v2614_v17 = vld [vmem:[#allocation9 + $0x8] sm:$0xff]  ;;  %vm1074_vm9 = vcmask 261126   ;;  %s2543_s16 = smov [#allocation11]  }
  0x3a   :  { %133 = vmatprep.subr.mxu0 %v81_v5  ;;  %2104 = vmatprep.subr.mxu1 %v2539_v0  ;;  %v2620_v18 = vld [vmem:[#allocation9] sm:$0xff]  ;;  %v86_v22 = vld [vmem:[%s2982_s4] sm:$0x3]  ;;  %s2541_s4 = smov 64   ;;  %s1974_s17 = sshll.u32 %s2543_s16, 4  ;;  %s1975_s17 = int_to_ptr.vmem [resolvable:$true] %s1974_s17 }
  0x3b   :  { %134 = vmatpush1.msra.mxu0 %v80_v6  ;;  %2105 = vmatpush3.msra.mxu1 %v2597_v11  ;;  %v91_v24 = vrot.slane %v86_v22, %v90_v21  ;;  %v95_v25 = vrot.slane %v86_v22, %v94_v23  ;;  %s2503_s18 = scalar_lea.vmem %s1975_s17, 256  ;;  %p2508_p7 = scmp.lt.s32.totalorder %s1975_s17, %s1975_s17 }
  0x3c   :  { %135 = vmatprep.subr.mxu0 %v79_v9  ;;  %2106 = vmatprep.subr.mxu1 %v2539_v0  ;;  %p2504_p6 = scmp.ne.s32.totalorder %s1975_s17, %s2503_s18  ;;  %p2509_p8 = scmp.lt.s32.totalorder %s2503_s18, %s2503_s18 }
  0x3d   :  { %136 = vmatpush1.msra.mxu0 %v78_v10  ;;  %2107 = vmatpush3.msra.mxu1 %v2608_v15 }
  0x3e   :  { %1988 = vmatmul.mubr.msk.f32.vlgmr.msra.gmra.mxu0 %vm98_vm1, %v76_v12  ;;  %2111 = vmatprep.subr.mxu0 %v2539_v0  ;;  %p2510_p9 = por %p2509_p8, %p2508_p7 }
  0x3f   :  { %175 = vmatprep.mubr.f32.mxu0 %v2539_v0  ;;  %2112 = vmatpush3.msra.mxu0 %v2600_v13 }
  0x40   :  { %2113 = vmatprep.subr.mxu0 %v2539_v0  ;;  %2109 = vmatmul.mubr.f32.vlgmr.msra.gmra.mxu1 %v2539_v0  ;;  %p2511_p10 = pnand %p2510_p9, %p2504_p6 }
  0x41   :  { %2114 = vmatpush3.msra.mxu0 %v2606_v14  ;;  %2122 = vmatprep.subr.mxu1 %v2539_v0 }
  0x42   :  { %1989 = vmatmul.mubr.msk.f32.gmra.mxu0 %vm98_vm1, %v77_v16  ;;  %2115 = vmatprep.subr.mxu0 %v2539_v0 }
  0x43   :  { %2116 = vmatpush3.msra.mxu0 %v2614_v17  ;;  %2119 = vmatprep.mubr.msk.f32.mxu0 %vm2540_vm0, %v2539_v0 }
  0x44   :  { %2117 = vmatprep.subr.mxu0 %v2539_v0  ;;  %2123 = vmatpush3.msra.mxu1 %v2591_v7 }
  0x45   :  { %2118 = vmatpush3.msra.mxu0 %v2620_v18  ;;  %2124 = vmatprep.subr.mxu1 %v2539_v0 }
  0x46   :  { %2120 = vmatmul.mubr.f32.vlgmr.msra.gmra.mxu0 %v2539_v0  ;;  %2130 = vmatprep.mubr.msk.f32.mxu1 %vm2540_vm0, %v2539_v0 }
  0x47   :  { %2125 = vmatpush3.msra.mxu1 %v2593_v8  ;;  %2133 = vmatprep.subr.mxu0 %v2539_v0 }
  0x48   :  { %2126 = vmatprep.subr.mxu1 %v2539_v0  ;;  %2134 = vmatpush3.msra.mxu0 %v2600_v13 }
  0x49   :  { %2127 = vmatpush3.msra.mxu1 %v2597_v11  ;;  %2135 = vmatprep.subr.mxu0 %v2539_v0 }
  0x4a   :  { %2128 = vmatprep.subr.mxu1 %v2539_v0  ;;  %2136 = vmatpush3.msra.mxu0 %v2606_v14 }
  0x4b   :  { %2129 = vmatpush3.msra.mxu1 %v2608_v15  ;;  %2137 = vmatprep.subr.mxu0 %v2539_v0 }
  0x4c   :  { %2138 = vmatpush3.msra.mxu0 %v2614_v17  ;;  %2141 = vmatprep.mubr.msk.f32.mxu0 %vm2540_vm0, %v2539_v0 }
  0x4d   :  { %2139 = vmatprep.subr.mxu0 %v2539_v0  ;;  %2144 = vmatprep.subr.mxu1 %v2539_v0 }
  0x4e   :  { %2140 = vmatpush3.msra.mxu0 %v2620_v18 }
  0x4f   :  { %2155 = vmatprep.subr.mxu0 %v2539_v0 }
  0xfe   :  { %v171_v26 = vpop.f32.mrf.mxu0 }
  0xff   :  { %v172_v27 = vadd.f32 %v171_v26, %v91_v24 }
 0x100   :  { %v173_v28 = vpop.f32.mrf.mxu0  ;;  %v264_v32 = vpop.f32.mrf.mxu1 }
 0x101   :  { %182 = vst [vmem:[#allocation2 + $0x10] sm:$0xff] %v172_v27  ;;  %v174_v29 = vadd.f32 %v173_v28, %v95_v25 }
 0x102   :  { %v177_v30 = vpop.f32.mrf.mxu0  ;;  %v2110_v35 = vpop.f32.mrf.mxu1 }
 0x103   :  { %183 = vst [vmem:[#allocation2] sm:$0xff] %v174_v29  ;;  %v178_v31 = vadd.f32 %v177_v30, %v91_v24 }
 0x104   :  { %v179_v33 = vpop.f32.mrf.mxu0 }
 0x105   :  { %184 = vst [vmem:[#allocation2 + $0x18] sm:$0xff] %v178_v31  ;;  %v180_v34 = vadd.f32 %v179_v33, %v95_v25 }
 0x106   :  { %v336_v36 = vpop.f32.mrf.mxu0 }
 0x107   :  { %185 = vst [vmem:[#allocation2 + $0x8] sm:$0xff] %v180_v34  ;;  %v341_v40 = vrot.slane %v336_v36, 2 }
 0x108   :  { %v194_v37 = vld [vmem:[#allocation2 + $0x10] sm:$0x3]  ;;  %v2121_v38 = vpop.f32.mrf.mxu0  ;;  %v405_v19 = vld [vmem:[#allocation2 + $0x10] sm:$0xc] }
 0x109   :  { %v268_v39 = vadd.f32 %v264_v32, %v194_v37 }
 0x10b   :  { %2290 = vtanh.f32 %v268_v39  ;;  %v1990_v45 = vmul.f32 -1.442695, %v268_v39 }
 0x10e   :  { %v269_v41 = vld [vmem:[#allocation2 + $0x8] sm:$0xc0]  ;;  %v482_v24 = vld [vmem:[#allocation2 + $0x8] sm:$0x30] }
 0x10f   :  { %v343_v42 = vadd.f32 %v341_v40, %v269_v41 }
 0x111   :  { %2292 = vtanh.f32 %v343_v42  ;;  %v1991_v46 = vmul.f32 -1.442695, %v343_v42 }
 0x112   :  { %2294 = vpow2.f32 %v1990_v45 }
 0x113   :  { %2296 = vpow2.f32 %v1991_v46 }
 0x118   :  { %v2291_v43 = vpop.eup %2290 }
 0x119   :  { %353 = vrot.lane.b32.xlu0 %v2291_v43, %s2541_s4 }
 0x11e   :  { %v2293_v44 = vpop.eup %2292 }
 0x11f   :  { %377 = vrot.lane.b32.xlu0 %v2293_v44, %s2541_s4  ;;  %v2295_v47 = vpop.eup %2294 }
 0x120   :  { %v347_v48 = vadd.f32 1.0, %v2295_v47  ;;  %v2297_v49 = vpop.eup %2296 }
 0x121   :  { %v371_v50 = vadd.f32 1.0, %v2297_v49 }
 0x122   :  { %2298 = vrcp.f32 %v347_v48 }
 0x123   :  { %2300 = vrcp.f32 %v371_v50 }
 0x12f   :  { %v2299_v51 = vpop.eup %2298 }
 0x130   :  { %v2301_v54 = vpop.eup %2300  ;;  %v351_v57 = vmul.f32 0.0, %v2299_v51 }
 0x131   :  { %v375_v60 = vmul.f32 0.0, %v2301_v54 }
 0x18b   :  { %v354_v52 = vpop.permute.xlu0 %353 }
 0x18c   :  { %v356_v53 = vmul.f32 %v2299_v51, %v354_v52 }
 0x18e   :  { %358 = vrot.lane.b32.xlu1 %v356_v53, %s2542_s15 }
 0x191   :  { %v378_v55 = vpop.permute.xlu0 %377 }
 0x192   :  { %v380_v56 = vmul.f32 %v2301_v54, %v378_v55 }
 0x194   :  { %382 = vrot.lane.b32.xlu1 %v380_v56, %s2542_s15 }
 0x200   :  { %v359_v58 = vpop.permute.xlu1 %358 }
 0x201   :  { %v2658_v59 = vadd.f32 %v359_v58, %v351_v57 }
 0x203   :  { %2302 = vtanh.f32 %v2658_v59  ;;  %v570_v41 = vrot.slane %v2658_v59, 6 }
 0x206   :  { %v383_v61 = vpop.permute.xlu1 %382 }
 0x207   :  { %v2661_v62 = vadd.f32 %v383_v61, %v375_v60  ;;  %v630_v61 = vld [vmem:[#allocation2 + $0x10] sm:$0x30] }
 0x209   :  { %2304 = vtanh.f32 %v2661_v62  ;;  %v597_v45 = vrot.slane %v2661_v62, 2 }
 0x210   :  { %v2303_v63 = vpop.eup %2302 }
 0x211   :  { %364 = vrot.lane.b32.xlu0 %v2303_v63, %s2541_s4 }
 0x216   :  { %v2305_v1 = vpop.eup %2304 }
 0x217   :  { %388 = vrot.lane.b32.xlu1 %v2305_v1, %s2541_s4 }
 0x283   :  { %v365_v2 = vpop.permute.xlu0 %364 }
 0x284   :  { %v367_v3 = vmul.f32 %v2299_v51, %v365_v2 }
 0x286   :  { %393 = vrot.lane.b32.xlu0 %v367_v3, %s2542_s15  ;;  %v710_v3 = vld [vmem:[#allocation2 + $0x8] sm:$0xc] }
 0x289   :  { %v389_v4 = vpop.permute.xlu1 %388 }
 0x28a   :  { %v2667_v5 = vmul.f32 %v2301_v54, %v389_v4 }
 0x28c   :  { %v483_v6 = vrot.slane %v2667_v5, 6 }
 0x28e   :  { %484 = vrot.lane.b32.xlu1 %v483_v6, %s2542_s15 }
 0x2f8   :  { %v394_v9 = vpop.permute.xlu0 %393 }
 0x2f9   :  { %397 = vst.msk [vmem:[#allocation11] sm:$0x3] %vm396_vm2, %v394_v9  ;;  %2131 = vmatmul.mubr.msk.f32.vlgmr.msra.gmra.mxu1 %vm98_vm1, %v394_v9 }
 0x2fa   :  { %2145 = vmatpush3.msra.mxu1 %v2591_v7  ;;  %2152 = vmatprep.mubr.msk.f32.mxu1 %vm2540_vm0, %v2539_v0 }
 0x2fb   :  { %2146 = vmatprep.subr.mxu1 %v2539_v0 }
 0x2fc   :  { %2147 = vmatpush3.msra.mxu1 %v2593_v8 }
 0x2fd   :  { %2148 = vmatprep.subr.mxu1 %v2539_v0 }
 0x2fe   :  { %2149 = vmatpush3.msra.mxu1 %v2597_v11 }
 0x2ff   :  { %2150 = vmatprep.subr.mxu1 %v2539_v0 }
 0x300   :  { %v485_v10 = vpop.permute.xlu1 %484  ;;  %2151 = vmatpush3.msra.mxu1 %v2608_v15 }
 0x301   :  { %2142 = vmatmul.mubr.msk.f32.vlgmr.msra.gmra.mxu0 %vm98_vm1, %v485_v10  ;;  %2166 = vmatprep.subr.mxu1 %v2539_v0 }
 0x302   :  { %2156 = vmatpush3.msra.mxu0 %v2600_v13  ;;  %2163 = vmatprep.mubr.msk.f32.mxu0 %vm2540_vm0, %v2539_v0 }
 0x303   :  { %2157 = vmatprep.subr.mxu0 %v2539_v0 }
 0x304   :  { %2158 = vmatpush3.msra.mxu0 %v2606_v14 }
 0x305   :  { %2159 = vmatprep.subr.mxu0 %v2539_v0 }
 0x306   :  { %2160 = vmatpush3.msra.mxu0 %v2614_v17 }
 0x307   :  { %2161 = vmatprep.subr.mxu0 %v2539_v0 }
 0x308   :  { %2162 = vmatpush3.msra.mxu0 %v2620_v18 }
 0x309   :  { %2177 = vmatprep.subr.mxu0 %v2539_v0 }
 0x3b9   :  { %v474_v12 = vpop.f32.mrf.mxu1 }
 0x3ba   :  { %v479_v16 = vrot.slane %v474_v12, 6 }
 0x3bb   :  { %v2132_v20 = vpop.f32.mrf.mxu1 }
 0x3bc   :  { %v481_v21 = vadd.f32 %v479_v16, %v405_v19 }
 0x3be   :  { %2306 = vtanh.f32 %v481_v21  ;;  %v1994_v29 = vmul.f32 -1.442695, %v481_v21 }
 0x3c1   :  { %v554_v22 = vpop.f32.mrf.mxu0 }
 0x3c2   :  { %v559_v23 = vrot.slane %v554_v22, 4 }
 0x3c3   :  { %v2143_v25 = vpop.f32.mrf.mxu0 }
 0x3c4   :  { %v561_v26 = vadd.f32 %v559_v23, %v482_v24 }
 0x3c6   :  { %2308 = vtanh.f32 %v561_v26  ;;  %v1995_v30 = vmul.f32 -1.442695, %v561_v26 }
 0x3c7   :  { %2310 = vpow2.f32 %v1994_v29 }
 0x3c8   :  { %2312 = vpow2.f32 %v1995_v30 }
 0x3cb   :  { %v2307_v27 = vpop.eup %2306 }
 0x3cc   :  { %574 = vrot.lane.b32.xlu0 %v2307_v27, %s2541_s4 }
 0x3d3   :  { %v2309_v28 = vpop.eup %2308 }
 0x3d4   :  { %601 = vrot.lane.b32.xlu1 %v2309_v28, %s2541_s4  ;;  %v2311_v31 = vpop.eup %2310 }
 0x3d5   :  { %v565_v32 = vadd.f32 1.0, %v2311_v31  ;;  %v2313_v33 = vpop.eup %2312 }
 0x3d6   :  { %v592_v34 = vadd.f32 1.0, %v2313_v33 }
 0x3d7   :  { %2314 = vrcp.f32 %v565_v32 }
 0x3d8   :  { %2316 = vrcp.f32 %v592_v34 }
 0x3e4   :  { %v2315_v35 = vpop.eup %2314 }
 0x3e5   :  { %v2317_v38 = vpop.eup %2316  ;;  %v572_v42 = vmul.f32 %v2315_v35, %v570_v41 }
 0x3e6   :  { %v599_v46 = vmul.f32 %v2317_v38, %v597_v45 }
 0x43e   :  { %v575_v36 = vpop.permute.xlu0 %574 }
 0x43f   :  { %v577_v37 = vmul.f32 %v2315_v35, %v575_v36 }
 0x441   :  { %579 = vrot.lane.b32.xlu0 %v577_v37, %s2542_s15 }
 0x446   :  { %v602_v39 = vpop.permute.xlu1 %601 }
 0x447   :  { %v604_v40 = vmul.f32 %v2317_v38, %v602_v39 }
 0x449   :  { %606 = vrot.lane.b32.xlu1 %v604_v40, %s2542_s15 }
 0x4b3   :  { %v580_v43 = vpop.permute.xlu0 %579 }
 0x4b4   :  { %v2699_v44 = vadd.f32 %v580_v43, %v572_v42 }
 0x4b6   :  { %2318 = vtanh.f32 %v2699_v44  ;;  %v798_v29 = vrot.slane %v2699_v44, 6 }
 0x4bb   :  { %v607_v47 = vpop.permute.xlu1 %606 }
 0x4bc   :  { %v2703_v48 = vadd.f32 %v607_v47, %v599_v46 }
 0x4be   :  { %2320 = vtanh.f32 %v2703_v48  ;;  %v825_v33 = vrot.slane %v2703_v48, 2 }
 0x4c3   :  { %v2319_v49 = vpop.eup %2318 }
 0x4c4   :  { %585 = vrot.lane.b32.xlu0 %v2319_v49, %s2541_s4  ;;  %v858_v49 = vld [vmem:[#allocation2 + $0x10] sm:$0xc0] }
 0x4cb   :  { %v2321_v50 = vpop.eup %2320 }
 0x4cc   :  { %612 = vrot.lane.b32.xlu1 %v2321_v50, %s2541_s4 }
 0x536   :  { %v586_v51 = vpop.permute.xlu0 %585 }
 0x537   :  { %v2708_v52 = vmul.f32 %v2315_v35, %v586_v51 }
 0x539   :  { %v631_v53 = vrot.slane %v2708_v52, 2 }
 0x53b   :  { %632 = vrot.lane.b32.xlu0 %v631_v53, %s2542_s15  ;;  %v938_v53 = vld [vmem:[#allocation2 + $0x8] sm:$0x3] }
 0x53e   :  { %v613_v54 = vpop.permute.xlu1 %612 }
 0x53f   :  { %v2712_v55 = vmul.f32 %v2317_v38, %v613_v54 }
 0x541   :  { %v711_v56 = vrot.slane %v2712_v55, 4 }
 0x543   :  { %712 = vrot.lane.b32.xlu1 %v711_v56, %s2542_s15 }
 0x5ad   :  { %v633_v57 = vpop.permute.xlu0 %632 }
 0x5ae   :  { %2153 = vmatmul.mubr.msk.f32.vlgmr.msra.gmra.mxu1 %vm98_vm1, %v633_v57 }
 0x5af   :  { %2167 = vmatpush3.msra.mxu1 %v2591_v7  ;;  %2174 = vmatprep.mubr.msk.f32.mxu1 %vm2540_vm0, %v2539_v0 }
 0x5b0   :  { %2168 = vmatprep.subr.mxu1 %v2539_v0 }
 0x5b1   :  { %2169 = vmatpush3.msra.mxu1 %v2593_v8 }
 0x5b2   :  { %2170 = vmatprep.subr.mxu1 %v2539_v0 }
 0x5b3   :  { %2171 = vmatpush3.msra.mxu1 %v2597_v11 }
 0x5b4   :  { %2172 = vmatprep.subr.mxu1 %v2539_v0 }
 0x5b5   :  { %v713_v58 = vpop.permute.xlu1 %712  ;;  %2173 = vmatpush3.msra.mxu1 %v2608_v15 }
 0x5b6   :  { %2164 = vmatmul.mubr.msk.f32.vlgmr.msra.gmra.mxu0 %vm98_vm1, %v713_v58  ;;  %2188 = vmatprep.subr.mxu1 %v2539_v0 }
 0x5b7   :  { %2178 = vmatpush3.msra.mxu0 %v2600_v13  ;;  %2185 = vmatprep.mubr.msk.f32.mxu0 %vm2540_vm0, %v2539_v0 }
 0x5b8   :  { %2179 = vmatprep.subr.mxu0 %v2539_v0 }
 0x5b9   :  { %2180 = vmatpush3.msra.mxu0 %v2606_v14 }
 0x5ba   :  { %2181 = vmatprep.subr.mxu0 %v2539_v0 }
 0x5bb   :  { %2182 = vmatpush3.msra.mxu0 %v2614_v17 }
 0x5bc   :  { %2183 = vmatprep.subr.mxu0 %v2539_v0 }
 0x5bd   :  { %2184 = vmatpush3.msra.mxu0 %v2620_v18 }
 0x5be   :  { %2199 = vmatprep.subr.mxu0 %v2539_v0 }
 0x66e   :  { %v702_v59 = vpop.f32.mrf.mxu1 }
 0x66f   :  { %v707_v60 = vrot.slane %v702_v59, 4 }
 0x670   :  { %v2154_v62 = vpop.f32.mrf.mxu1 }
 0x671   :  { %v709_v63 = vadd.f32 %v707_v60, %v630_v61 }
 0x673   :  { %2322 = vtanh.f32 %v709_v63  ;;  %v1998_v12 = vmul.f32 -1.442695, %v709_v63 }
 0x676   :  { %v782_v1 = vpop.f32.mrf.mxu0 }
 0x677   :  { %v787_v2 = vrot.slane %v782_v1, 6 }
 0x678   :  { %v2165_v4 = vpop.f32.mrf.mxu0 }
 0x679   :  { %v789_v6 = vadd.f32 %v787_v2, %v710_v3 }
 0x67b   :  { %2324 = vtanh.f32 %v789_v6  ;;  %v1999_v16 = vmul.f32 -1.442695, %v789_v6 }
 0x67c   :  { %2326 = vpow2.f32 %v1998_v12 }
 0x67d   :  { %2328 = vpow2.f32 %v1999_v16 }
 0x680   :  { %v2323_v9 = vpop.eup %2322 }
 0x681   :  { %802 = vrot.lane.b32.xlu0 %v2323_v9, %s2541_s4 }
 0x688   :  { %v2325_v10 = vpop.eup %2324 }
 0x689   :  { %829 = vrot.lane.b32.xlu1 %v2325_v10, %s2541_s4  ;;  %v2327_v19 = vpop.eup %2326 }
 0x68a   :  { %v793_v20 = vadd.f32 1.0, %v2327_v19  ;;  %v2329_v21 = vpop.eup %2328 }
 0x68b   :  { %v820_v22 = vadd.f32 1.0, %v2329_v21 }
 0x68c   :  { %2330 = vrcp.f32 %v793_v20 }
 0x68d   :  { %2332 = vrcp.f32 %v820_v22 }
 0x699   :  { %v2331_v23 = vpop.eup %2330 }
 0x69a   :  { %v2333_v26 = vpop.eup %2332  ;;  %v800_v30 = vmul.f32 %v2331_v23, %v798_v29 }
 0x69b   :  { %v827_v34 = vmul.f32 %v2333_v26, %v825_v33 }
 0x6f3   :  { %v803_v24 = vpop.permute.xlu0 %802 }
 0x6f4   :  { %v805_v25 = vmul.f32 %v2331_v23, %v803_v24 }
 0x6f6   :  { %807 = vrot.lane.b32.xlu0 %v805_v25, %s2542_s15 }
 0x6fb   :  { %v830_v27 = vpop.permute.xlu1 %829 }
 0x6fc   :  { %v832_v28 = vmul.f32 %v2333_v26, %v830_v27 }
 0x6fe   :  { %834 = vrot.lane.b32.xlu1 %v832_v28, %s2542_s15 }
 0x768   :  { %v808_v31 = vpop.permute.xlu0 %807 }
 0x769   :  { %v2743_v32 = vadd.f32 %v808_v31, %v800_v30 }
 0x76b   :  { %2334 = vtanh.f32 %v2743_v32  ;;  %v1023_v16 = vrot.slane %v2743_v32, 6 }
 0x770   :  { %v835_v35 = vpop.permute.xlu1 %834 }
 0x771   :  { %v2747_v36 = vadd.f32 %v835_v35, %v827_v34  ;;  %v1083_v35 = vld [vmem:[#allocation2 + $0x18] sm:$0x3] }
 0x773   :  { %2336 = vtanh.f32 %v2747_v36  ;;  %v1050_v22 = vrot.slane %v2747_v36, 2 }
 0x778   :  { %v2335_v37 = vpop.eup %2334 }
 0x779   :  { %813 = vrot.lane.b32.xlu0 %v2335_v37, %s2541_s4 }
 0x780   :  { %v2337_v38 = vpop.eup %2336 }
 0x781   :  { %840 = vrot.lane.b32.xlu1 %v2337_v38, %s2541_s4 }
 0x7eb   :  { %v814_v39 = vpop.permute.xlu0 %813 }
 0x7ec   :  { %v2752_v40 = vmul.f32 %v2331_v23, %v814_v39 }
 0x7ee   :  { %v859_v41 = vrot.slane %v2752_v40, 4 }
 0x7f0   :  { %860 = vrot.lane.b32.xlu0 %v859_v41, %s2542_s15 }
 0x7f3   :  { %v841_v42 = vpop.permute.xlu1 %840 }
 0x7f4   :  { %v2756_v43 = vmul.f32 %v2333_v26, %v841_v42  ;;  %v1160_v42 = vld [vmem:[#allocation2] sm:$0xc0] }
 0x7f6   :  { %v939_v44 = vrot.slane %v2756_v43, 2 }
 0x7f8   :  { %940 = vrot.lane.b32.xlu1 %v939_v44, %s2542_s15 }
 0x862   :  { %v861_v45 = vpop.permute.xlu0 %860 }
 0x863   :  { %2175 = vmatmul.mubr.msk.f32.vlgmr.msra.gmra.mxu1 %vm98_vm1, %v861_v45 }
 0x864   :  { %2189 = vmatpush3.msra.mxu1 %v2591_v7  ;;  %2196 = vmatprep.mubr.msk.f32.mxu1 %vm2540_vm0, %v2539_v0 }
 0x865   :  { %2190 = vmatprep.subr.mxu1 %v2539_v0 }
 0x866   :  { %2191 = vmatpush3.msra.mxu1 %v2593_v8 }
 0x867   :  { %2192 = vmatprep.subr.mxu1 %v2539_v0 }
 0x868   :  { %2193 = vmatpush3.msra.mxu1 %v2597_v11 }
 0x869   :  { %2194 = vmatprep.subr.mxu1 %v2539_v0 }
 0x86a   :  { %v941_v46 = vpop.permute.xlu1 %940  ;;  %2195 = vmatpush3.msra.mxu1 %v2608_v15 }
 0x86b   :  { %2186 = vmatmul.mubr.msk.f32.vlgmr.msra.gmra.mxu0 %vm98_vm1, %v941_v46  ;;  %2210 = vmatprep.subr.mxu1 %v2539_v0 }
 0x86c   :  { %2200 = vmatpush3.msra.mxu0 %v2600_v13  ;;  %2207 = vmatprep.mubr.msk.f32.mxu0 %vm2540_vm0, %v2539_v0 }
 0x86d   :  { %2201 = vmatprep.subr.mxu0 %v2539_v0 }
 0x86e   :  { %2202 = vmatpush3.msra.mxu0 %v2606_v14 }
 0x86f   :  { %2203 = vmatprep.subr.mxu0 %v2539_v0 }
 0x870   :  { %2204 = vmatpush3.msra.mxu0 %v2614_v17 }
 0x871   :  { %2205 = vmatprep.subr.mxu0 %v2539_v0 }
 0x872   :  { %2206 = vmatpush3.msra.mxu0 %v2620_v18 }
 0x873   :  { %2221 = vmatprep.subr.mxu0 %v2539_v0 }
 0x923   :  { %v930_v47 = vpop.f32.mrf.mxu1 }
 0x924   :  { %v935_v48 = vrot.slane %v930_v47, 2 }
 0x925   :  { %v2176_v50 = vpop.f32.mrf.mxu1 }
 0x926   :  { %v937_v51 = vadd.f32 %v935_v48, %v858_v49 }
 0x928   :  { %2338 = vtanh.f32 %v937_v51  ;;  %v2002_v60 = vmul.f32 -1.442695, %v937_v51 }
 0x92b   :  { %v1010_v54 = vpop.f32.mrf.mxu0 }
 0x92c   :  { %v1014_v56 = vadd.f32 %v1010_v54, %v938_v53 }
 0x92d   :  { %v2187_v57 = vpop.f32.mrf.mxu0 }
 0x92e   :  { %2340 = vtanh.f32 %v1014_v56  ;;  %v2003_v61 = vmul.f32 -1.442695, %v1014_v56 }
 0x92f   :  { %2342 = vpow2.f32 %v2002_v60 }
 0x930   :  { %2344 = vpow2.f32 %v2003_v61 }
 0x935   :  { %v2339_v58 = vpop.eup %2338 }
 0x936   :  { %1027 = vrot.lane.b32.xlu0 %v2339_v58, %s2541_s4 }
 0x93b   :  { %v2341_v59 = vpop.eup %2340 }
 0x93c   :  { %1054 = vrot.lane.b32.xlu1 %v2341_v59, %s2541_s4  ;;  %v2343_v62 = vpop.eup %2342 }
 0x93d   :  { %v1018_v63 = vadd.f32 1.0, %v2343_v62  ;;  %v2345_v1 = vpop.eup %2344 }
 0x93e   :  { %v1045_v2 = vadd.f32 1.0, %v2345_v1 }
 0x93f   :  { %2346 = vrcp.f32 %v1018_v63 }
 0x940   :  { %2348 = vrcp.f32 %v1045_v2 }
 0x94c   :  { %v2347_v3 = vpop.eup %2346 }
 0x94d   :  { %v2349_v9 = vpop.eup %2348  ;;  %v1025_v19 = vmul.f32 %v2347_v3, %v1023_v16 }
 0x94e   :  { %v1052_v23 = vmul.f32 %v2349_v9, %v1050_v22 }
 0x9a8   :  { %v1028_v4 = vpop.permute.xlu0 %1027 }
 0x9a9   :  { %v1030_v6 = vmul.f32 %v2347_v3, %v1028_v4 }
 0x9ab   :  { %1032 = vrot.lane.b32.xlu0 %v1030_v6, %s2542_s15 }
 0x9ae   :  { %v1055_v10 = vpop.permute.xlu1 %1054 }
 0x9af   :  { %v1057_v12 = vmul.f32 %v2349_v9, %v1055_v10 }
 0x9b1   :  { %1059 = vrot.lane.b32.xlu1 %v1057_v12, %s2542_s15 }
 0xa1d   :  { %v1033_v20 = vpop.permute.xlu0 %1032 }
 0xa1e   :  { %v2787_v21 = vadd.f32 %v1033_v20, %v1025_v19 }
 0xa20   :  { %2350 = vtanh.f32 %v2787_v21  ;;  %v1247_v62 = vrot.slane %v2787_v21, 6 }
 0xa23   :  { %v1060_v24 = vpop.permute.xlu1 %1059 }
 0xa24   :  { %v2791_v25 = vadd.f32 %v1060_v24, %v1052_v23 }
 0xa26   :  { %2352 = vtanh.f32 %v2791_v25 }
 0xa2d   :  { %v2351_v26 = vpop.eup %2350 }
 0xa2e   :  { %1038 = vrot.lane.b32.xlu0 %v2351_v26, %s2541_s4 }
 0xa33   :  { %v2353_v27 = vpop.eup %2352 }
 0xa34   :  { %1065 = vrot.lane.b32.xlu1 %v2353_v27, %s2541_s4 }
 0xaa0   :  { %v1039_v28 = vpop.permute.xlu0 %1038 }
 0xaa1   :  { %v2796_v29 = vmul.f32 %v2347_v3, %v1039_v28  ;;  %v1274_v3 = vrot.slane %v2791_v25, 2  ;;  %v1380_v28 = vld [vmem:[#allocation2] sm:$0x30] }
 0xaa3   :  { %v1084_v30 = vrot.slane %v2796_v29, 6 }
 0xaa5   :  { %1085 = vrot.lane.b32.xlu1 %v1084_v30, %s2542_s15 }
 0xaa6   :  { %v1066_v31 = vpop.permute.xlu1 %1065 }
 0xaa7   :  { %v2800_v32 = vmul.f32 %v2349_v9, %v1066_v31 }
 0xaa9   :  { %1161 = vrot.lane.b32.xlu0 %v2800_v32, %s2542_s15 }
 0xb17   :  { %v1086_v33 = vpop.permute.xlu1 %1085 }
 0xb18   :  { %2197 = vmatmul.mubr.msk.f32.vlgmr.msra.gmra.mxu1 %vm98_vm1, %v1086_v33 }
 0xb19   :  { %2211 = vmatpush3.msra.mxu1 %v2591_v7  ;;  %2218 = vmatprep.mubr.msk.f32.mxu1 %vm2540_vm0, %v2539_v0 }
 0xb1a   :  { %2212 = vmatprep.subr.mxu1 %v2539_v0 }
 0xb1b   :  { %v1162_v34 = vpop.permute.xlu0 %1161  ;;  %2213 = vmatpush3.msra.mxu1 %v2593_v8 }
 0xb1c   :  { %2208 = vmatmul.mubr.msk.f32.vlgmr.msra.gmra.mxu0 %vm98_vm1, %v1162_v34  ;;  %2214 = vmatprep.subr.mxu1 %v2539_v0 }
 0xb1d   :  { %2215 = vmatpush3.msra.mxu1 %v2597_v11  ;;  %2222 = vmatpush3.msra.mxu0 %v2600_v13 }
 0xb1e   :  { %2216 = vmatprep.subr.mxu1 %v2539_v0  ;;  %2223 = vmatprep.subr.mxu0 %v2539_v0 }
 0xb1f   :  { %2217 = vmatpush3.msra.mxu1 %v2608_v15  ;;  %2224 = vmatpush3.msra.mxu0 %v2606_v14 }
 0xb20   :  { %2225 = vmatprep.subr.mxu0 %v2539_v0  ;;  %2229 = vmatprep.mubr.msk.f32.mxu0 %vm2540_vm0, %v2539_v0 }
 0xb21   :  { %2226 = vmatpush3.msra.mxu0 %v2614_v17  ;;  %2232 = vmatprep.subr.mxu1 %v2539_v0 }
 0xb22   :  { %2227 = vmatprep.subr.mxu0 %v2539_v0 }
 0xb23   :  { %2228 = vmatpush3.msra.mxu0 %v2620_v18 }
 0xb24   :  { %2243 = vmatprep.subr.mxu0 %v2539_v0 }
 0xbd8   :  { %v1155_v36 = vpop.f32.mrf.mxu1 }
 0xbd9   :  { %v1159_v37 = vadd.f32 %v1155_v36, %v1083_v35 }
 0xbda   :  { %v2198_v38 = vpop.f32.mrf.mxu1 }
 0xbdb   :  { %2354 = vtanh.f32 %v1159_v37  ;;  %v2006_v48 = vmul.f32 -1.442695, %v1159_v37 }
 0xbdc   :  { %v1231_v39 = vpop.f32.mrf.mxu0 }
 0xbdd   :  { %v1236_v41 = vrot.slane %v1231_v39, 2 }
 0xbde   :  { %v2209_v44 = vpop.f32.mrf.mxu0 }
 0xbdf   :  { %v1238_v45 = vadd.f32 %v1236_v41, %v1160_v42 }
 0xbe1   :  { %2356 = vtanh.f32 %v1238_v45  ;;  %v2007_v49 = vmul.f32 -1.442695, %v1238_v45 }
 0xbe2   :  { %2358 = vpow2.f32 %v2006_v48 }
 0xbe3   :  { %2360 = vpow2.f32 %v2007_v49 }
 0xbe8   :  { %v2355_v46 = vpop.eup %2354 }
 0xbe9   :  { %1251 = vrot.lane.b32.xlu0 %v2355_v46, %s2541_s4 }
 0xbee   :  { %v2357_v47 = vpop.eup %2356 }
 0xbef   :  { %1278 = vrot.lane.b32.xlu1 %v2357_v47, %s2541_s4  ;;  %v2359_v50 = vpop.eup %2358 }
 0xbf0   :  { %v1242_v51 = vadd.f32 1.0, %v2359_v50  ;;  %v2361_v53 = vpop.eup %2360 }
 0xbf1   :  { %v1269_v54 = vadd.f32 1.0, %v2361_v53 }
 0xbf2   :  { %2362 = vrcp.f32 %v1242_v51 }
 0xbf3   :  { %2364 = vrcp.f32 %v1269_v54 }
 0xbff   :  { %v2363_v56 = vpop.eup %2362 }
 0xc00   :  { %v2365_v59 = vpop.eup %2364  ;;  %v1249_v63 = vmul.f32 %v2363_v56, %v1247_v62 }
 0xc01   :  { %v1276_v4 = vmul.f32 %v2365_v59, %v1274_v3 }
 0xc5b   :  { %v1252_v57 = vpop.permute.xlu0 %1251 }
 0xc5c   :  { %v1254_v58 = vmul.f32 %v2363_v56, %v1252_v57 }
 0xc5e   :  { %1256 = vrot.lane.b32.xlu0 %v1254_v58, %s2542_s15 }
 0xc61   :  { %v1279_v60 = vpop.permute.xlu1 %1278 }
 0xc62   :  { %v1281_v61 = vmul.f32 %v2365_v59, %v1279_v60 }
 0xc64   :  { %1283 = vrot.lane.b32.xlu1 %v1281_v61, %s2542_s15 }
 0xcd0   :  { %v1257_v1 = vpop.permute.xlu0 %1256 }
 0xcd1   :  { %v2831_v2 = vadd.f32 %v1257_v1, %v1249_v63 }
 0xcd3   :  { %2366 = vtanh.f32 %v2831_v2  ;;  %v1468_v48 = vrot.slane %v2831_v2, 6 }
 0xcd6   :  { %v1284_v6 = vpop.permute.xlu1 %1283 }
 0xcd7   :  { %v2835_v9 = vadd.f32 %v1284_v6, %v1276_v4  ;;  %v2418_v4 = vld [vmem:[#allocation8 + $0x18] sm:$0xff]  ;;  %v2419_v6 = vld [vmem:[#allocation8 + $0x10] sm:$0xff] }
 0xcd9   :  { %2368 = vtanh.f32 %v2835_v9  ;;  %v1495_v53 = vrot.slane %v2835_v9, 2  ;;  %v2420_v9 = vld [vmem:[#allocation8 + $0x8] sm:$0xff] }
 0xce0   :  { %v2367_v10 = vpop.eup %2366 }
 0xce1   :  { %1262 = vrot.lane.b32.xlu0 %v2367_v10, %s2541_s4 }
 0xce6   :  { %v2369_v12 = vpop.eup %2368 }
 0xce7   :  { %1289 = vrot.lane.b32.xlu1 %v2369_v12, %s2541_s4  ;;  %v2421_v12 = vld [vmem:[#allocation9 + $0x18] sm:$0xff] }
 0xd53   :  { %v1263_v16 = vpop.permute.xlu0 %1262 }
 0xd54   :  { %v1265_v19 = vmul.f32 %v2363_v56, %v1263_v16  ;;  %v2422_v16 = vld [vmem:[#allocation9 + $0x10] sm:$0xff] }
 0xd56   :  { %1294 = vrot.lane.b32.xlu0 %v1265_v19, %s2542_s15 }
 0xd59   :  { %v1290_v20 = vpop.permute.xlu1 %1289 }
 0xd5a   :  { %v2841_v21 = vmul.f32 %v2365_v59, %v1290_v20  ;;  %v1524_v20 = vld [vmem:[#allocation2 + $0x18] sm:$0x30] }
 0xd5c   :  { %v1381_v22 = vrot.slane %v2841_v21, 6 }
 0xd5e   :  { %1382 = vrot.lane.b32.xlu1 %v1381_v22, %s2542_s15 }
 0xdc8   :  { %v2845_v23 = vpop.permute.xlu0 %1294 }
 0xdc9   :  { %2219 = vmatmul.mubr.msk.f32.vlgmr.msra.gmra.mxu1 %vm98_vm1, %v2845_v23 }
 0xdca   :  { %2233 = vmatpush3.msra.mxu1 %v2591_v7  ;;  %2240 = vmatprep.mubr.msk.f32.mxu1 %vm2540_vm0, %v2539_v0 }
 0xdcb   :  { %2234 = vmatprep.subr.mxu1 %v2539_v0 }
 0xdcc   :  { %2235 = vmatpush3.msra.mxu1 %v2593_v8 }
 0xdcd   :  { %2236 = vmatprep.subr.mxu1 %v2539_v0 }
 0xdce   :  { %2237 = vmatpush3.msra.mxu1 %v2597_v11  ;;  %v1303_v11 = vld [vmem:[#allocation2 + $0x18] sm:$0xc] }
 0xdcf   :  { %2238 = vmatprep.subr.mxu1 %v2539_v0 }
 0xdd0   :  { %v1383_v24 = vpop.permute.xlu1 %1382  ;;  %2239 = vmatpush3.msra.mxu1 %v2608_v15 }
 0xdd1   :  { %2230 = vmatmul.mubr.msk.f32.vlgmr.msra.gmra.mxu0 %vm98_vm1, %v1383_v24  ;;  %2254 = vmatprep.subr.mxu1 %v2539_v0 }
 0xdd2   :  { %2244 = vmatpush3.msra.mxu0 %v2600_v13  ;;  %2251 = vmatprep.mubr.msk.f32.mxu0 %vm2540_vm0, %v2539_v0 }
 0xdd3   :  { %2245 = vmatprep.subr.mxu0 %v2539_v0 }
 0xdd4   :  { %2246 = vmatpush3.msra.mxu0 %v2606_v14 }
 0xdd5   :  { %2247 = vmatprep.subr.mxu0 %v2539_v0 }
 0xdd6   :  { %2248 = vmatpush3.msra.mxu0 %v2614_v17 }
 0xdd7   :  { %2249 = vmatprep.subr.mxu0 %v2539_v0 }
 0xdd8   :  { %2250 = vmatpush3.msra.mxu0 %v2620_v18 }
 0xdd9   :  { %2265 = vmatprep.subr.mxu0 %v2539_v0 }
 0xe89   :  { %v1372_v7 = vpop.f32.mrf.mxu1 }
 0xe8a   :  { %v1377_v8 = vrot.slane %v1372_v7, 6 }
 0xe8b   :  { %v2220_v13 = vpop.f32.mrf.mxu1 }
 0xe8c   :  { %v1379_v25 = vadd.f32 %v1377_v8, %v1303_v11  ;;  %v1604_v11 = vld [vmem:[#allocation2] sm:$0xc] }
 0xe8e   :  { %2370 = vtanh.f32 %v1379_v25  ;;  %v2010_v34 = vmul.f32 -1.442695, %v1379_v25 }
 0xe91   :  { %v1452_v26 = vpop.f32.mrf.mxu0 }
 0xe92   :  { %v1457_v27 = vrot.slane %v1452_v26, 4 }
 0xe93   :  { %v2231_v14 = vpop.f32.mrf.mxu0 }
 0xe94   :  { %v1459_v30 = vadd.f32 %v1457_v27, %v1380_v28 }
 0xe96   :  { %2372 = vtanh.f32 %v1459_v30  ;;  %v2011_v35 = vmul.f32 -1.442695, %v1459_v30 }
 0xe97   :  { %2374 = vpow2.f32 %v2010_v34 }
 0xe98   :  { %2376 = vpow2.f32 %v2011_v35 }
 0xe9b   :  { %v2371_v31 = vpop.eup %2370 }
 0xe9c   :  { %1472 = vrot.lane.b32.xlu0 %v2371_v31, %s2541_s4 }
 0xea3   :  { %v2373_v33 = vpop.eup %2372 }
 0xea4   :  { %1499 = vrot.lane.b32.xlu1 %v2373_v33, %s2541_s4  ;;  %v2375_v36 = vpop.eup %2374 }
 0xea5   :  { %v1463_v37 = vadd.f32 1.0, %v2375_v36  ;;  %v2377_v38 = vpop.eup %2376 }
 0xea6   :  { %v1490_v39 = vadd.f32 1.0, %v2377_v38 }
 0xea7   :  { %2378 = vrcp.f32 %v1463_v37 }
 0xea8   :  { %2380 = vrcp.f32 %v1490_v39 }
 0xeb4   :  { %v2379_v41 = vpop.eup %2378 }
 0xeb5   :  { %v2381_v45 = vpop.eup %2380  ;;  %v1470_v49 = vmul.f32 %v2379_v41, %v1468_v48 }
 0xeb6   :  { %v1497_v54 = vmul.f32 %v2381_v45, %v1495_v53 }
 0xf0e   :  { %v1473_v42 = vpop.permute.xlu0 %1472 }
 0xf0f   :  { %v1475_v44 = vmul.f32 %v2379_v41, %v1473_v42 }
 0xf11   :  { %1477 = vrot.lane.b32.xlu0 %v1475_v44, %s2542_s15 }
 0xf16   :  { %v1500_v46 = vpop.permute.xlu1 %1499 }
 0xf17   :  { %v1502_v47 = vmul.f32 %v2381_v45, %v1500_v46 }
 0xf19   :  { %1504 = vrot.lane.b32.xlu1 %v1502_v47, %s2542_s15 }
 0xf83   :  { %v1478_v50 = vpop.permute.xlu0 %1477 }
 0xf84   :  { %v2875_v51 = vadd.f32 %v1478_v50, %v1470_v49 }
 0xf86   :  { %2382 = vtanh.f32 %v2875_v51  ;;  %v1692_v38 = vrot.slane %v2875_v51, 6 }
 0xf8b   :  { %v1505_v56 = vpop.permute.xlu1 %1504 }
 0xf8c   :  { %v2879_v57 = vadd.f32 %v1505_v56, %v1497_v54 }
 0xf8e   :  { %2384 = vtanh.f32 %v2879_v57  ;;  %v1719_v44 = vrot.slane %v2879_v57, 2 }
 0xf93   :  { %v2383_v58 = vpop.eup %2382 }
 0xf94   :  { %1483 = vrot.lane.b32.xlu0 %v2383_v58, %s2541_s4 }
 0xf9b   :  { %v2385_v59 = vpop.eup %2384 }
 0xf9c   :  { %1510 = vrot.lane.b32.xlu1 %v2385_v59, %s2541_s4 }
0x1006   :  { %v1484_v60 = vpop.permute.xlu0 %1483 }
0x1007   :  { %v2884_v61 = vmul.f32 %v2379_v41, %v1484_v60 }
0x1009   :  { %v1525_v62 = vrot.slane %v2884_v61, 2 }
0x100b   :  { %1526 = vrot.lane.b32.xlu0 %v1525_v62, %s2542_s15 }
0x100e   :  { %v1511_v63 = vpop.permute.xlu1 %1510 }
0x100f   :  { %v2888_v1 = vmul.f32 %v2381_v45, %v1511_v63  ;;  %v1748_v63 = vld [vmem:[#allocation2 + $0x18] sm:$0xc0] }
0x1011   :  { %v1605_v2 = vrot.slane %v2888_v1, 4 }
0x1013   :  { %1606 = vrot.lane.b32.xlu1 %v1605_v2, %s2542_s15 }
0x107d   :  { %v1527_v3 = vpop.permute.xlu0 %1526 }
0x107e   :  { %2241 = vmatmul.mubr.msk.f32.vlgmr.msra.gmra.mxu1 %vm98_vm1, %v1527_v3 }
0x107f   :  { %2255 = vmatpush3.msra.mxu1 %v2418_v4  ;;  %2262 = vmatprep.mubr.msk.f32.mxu1 %vm2540_vm0, %v2539_v0  ;;  %v1828_v4 = vld [vmem:[#allocation2] sm:$0x3] }
0x1080   :  { %2256 = vmatprep.subr.mxu1 %v2539_v0 }
0x1081   :  { %2257 = vmatpush3.msra.mxu1 %v2419_v6 }
0x1082   :  { %2258 = vmatprep.subr.mxu1 %v2539_v0 }
0x1083   :  { %2259 = vmatpush3.msra.mxu1 %v2420_v9 }
0x1084   :  { %2260 = vmatprep.subr.mxu1 %v2539_v0 }
0x1085   :  { %v1607_v10 = vpop.permute.xlu1 %1606  ;;  %2261 = vmatpush3.msra.mxu1 %v2608_v15 }
0x1086   :  { %2252 = vmatmul.mubr.msk.f32.vlgmr.msra.gmra.mxu0 %vm98_vm1, %v1607_v10 }
0x1087   :  { %2266 = vmatpush3.msra.mxu0 %v2421_v12  ;;  %2273 = vmatprep.mubr.msk.f32.mxu0 %vm2540_vm0, %v2539_v0 }
0x1088   :  { %2267 = vmatprep.subr.mxu0 %v2539_v0 }
0x1089   :  { %2268 = vmatpush3.msra.mxu0 %v2422_v16 }
0x108a   :  { %2269 = vmatprep.subr.mxu0 %v2539_v0 }
0x108b   :  { %2270 = vmatpush3.msra.mxu0 %v2614_v17 }
0x108c   :  { %2271 = vmatprep.subr.mxu0 %v2539_v0 }
0x108d   :  { %2272 = vmatpush3.msra.mxu0 %v2620_v18 }
0x113e   :  { %v1596_v15 = vpop.f32.mrf.mxu1 }
0x113f   :  { %v1601_v19 = vrot.slane %v1596_v15, 4 }
0x1140   :  { %v2242_v22 = vpop.f32.mrf.mxu1 }
0x1141   :  { %v1603_v24 = vadd.f32 %v1601_v19, %v1524_v20 }
0x1143   :  { %2386 = vtanh.f32 %v1603_v24  ;;  %v2014_v0 = vmul.f32 -1.442695, %v1603_v24 }
0x1146   :  { %v1676_v7 = vpop.f32.mrf.mxu0 }
0x1147   :  { %v1681_v8 = vrot.slane %v1676_v7, 6 }
0x1148   :  { %v2253_v13 = vpop.f32.mrf.mxu0 }
0x1149   :  { %v1683_v25 = vadd.f32 %v1681_v8, %v1604_v11 }
0x114b   :  { %2388 = vtanh.f32 %v1683_v25  ;;  %v2015_v18 = vmul.f32 -1.442695, %v1683_v25 }
0x114c   :  { %2390 = vpow2.f32 %v2014_v0 }
0x114d   :  { %2392 = vpow2.f32 %v2015_v18 }
0x1150   :  { %v2387_v26 = vpop.eup %2386 }
0x1151   :  { %1696 = vrot.lane.b32.xlu0 %v2387_v26, %s2541_s4 }
0x1158   :  { %v2389_v17 = vpop.eup %2388 }
0x1159   :  { %1723 = vrot.lane.b32.xlu1 %v2389_v17, %s2541_s4  ;;  %v2391_v27 = vpop.eup %2390 }
0x115a   :  { %v1687_v28 = vadd.f32 1.0, %v2391_v27  ;;  %v2393_v14 = vpop.eup %2392 }
0x115b   :  { %v1714_v30 = vadd.f32 1.0, %v2393_v14 }
0x115c   :  { %2394 = vrcp.f32 %v1687_v28 }
0x115d   :  { %2396 = vrcp.f32 %v1714_v30 }
0x1169   :  { %v2395_v31 = vpop.eup %2394 }
0x116a   :  { %v2397_v35 = vpop.eup %2396  ;;  %v1694_v39 = vmul.f32 %v2395_v31, %v1692_v38 }
0x116b   :  { %v1721_v45 = vmul.f32 %v2397_v35, %v1719_v44 }
0x11c3   :  { %v1697_v33 = vpop.permute.xlu0 %1696 }
0x11c4   :  { %v1699_v34 = vmul.f32 %v2395_v31, %v1697_v33 }
0x11c6   :  { %1701 = vrot.lane.b32.xlu0 %v1699_v34, %s2542_s15 }
0x11cb   :  { %v1724_v36 = vpop.permute.xlu1 %1723 }
0x11cc   :  { %v1726_v37 = vmul.f32 %v2397_v35, %v1724_v36 }
0x11ce   :  { %1728 = vrot.lane.b32.xlu1 %v1726_v37, %s2542_s15 }
0x1238   :  { %v1702_v41 = vpop.permute.xlu0 %1701 }
0x1239   :  { %v1704_v42 = vadd.f32 %v1702_v41, %v1694_v39 }
0x123b   :  { %2398 = vtanh.f32 %v1704_v42  ;;  %v1913_v0 = vrot.slane %v1704_v42, 6 }
0x1240   :  { %v1729_v46 = vpop.permute.xlu1 %1728 }
0x1241   :  { %v1731_v47 = vadd.f32 %v1729_v46, %v1721_v45 }
0x1243   :  { %2400 = vtanh.f32 %v1731_v47  ;;  %v1940_v14 = vrot.slane %v1731_v47, 2 }
0x1248   :  { %v2399_v48 = vpop.eup %2398 }
0x1249   :  { %1707 = vrot.lane.b32.xlu0 %v2399_v48, %s2541_s4 }
0x1250   :  { %v2401_v49 = vpop.eup %2400 }
0x1251   :  { %1734 = vrot.lane.b32.xlu1 %v2401_v49, %s2541_s4 }
0x12bb   :  { %v1708_v50 = vpop.permute.xlu0 %1707 }
0x12bc   :  { %v2915_v53 = vmul.f32 %v2395_v31, %v1708_v50 }
0x12be   :  { %v1749_v51 = vrot.slane %v2915_v53, 4 }
0x12c0   :  { %1750 = vrot.lane.b32.xlu0 %v1749_v51, %s2542_s15 }
0x12c3   :  { %v1735_v54 = vpop.permute.xlu1 %1734 }
0x12c4   :  { %v2919_v56 = vmul.f32 %v2397_v35, %v1735_v54 }
0x12c6   :  { %v1829_v57 = vrot.slane %v2919_v56, 2 }
0x12c8   :  { %1830 = vrot.lane.b32.xlu1 %v1829_v57, %s2542_s15 }
0x1332   :  { %v1751_v58 = vpop.permute.xlu0 %1750 }
0x1333   :  { %2263 = vmatmul.mubr.msk.f32.vlgmr.msra.gmra.mxu1 %vm98_vm1, %v1751_v58 }
0x133a   :  { %v1831_v59 = vpop.permute.xlu1 %1830 }
0x133b   :  { %2274 = vmatmul.mubr.msk.f32.vlgmr.msra.gmra.mxu0 %vm98_vm1, %v1831_v59 }
0x13f3   :  { %v1820_v60 = vpop.f32.mrf.mxu1 }
0x13f4   :  { %v1825_v62 = vrot.slane %v1820_v60, 2 }
0x13f5   :  { %v2264_v2 = vpop.f32.mrf.mxu1 }
0x13f6   :  { %v1827_v3 = vadd.f32 %v1825_v62, %v1748_v63 }
0x13f8   :  { %2402 = vtanh.f32 %v1827_v3  ;;  %v2018_v15 = vmul.f32 -1.442695, %v1827_v3 }
0x13fb   :  { %v1900_v6 = vpop.f32.mrf.mxu0 }
0x13fc   :  { %v1904_v9 = vadd.f32 %v1900_v6, %v1828_v4 }
0x13fd   :  { %v2275_v10 = vpop.f32.mrf.mxu0 }
0x13fe   :  { %2404 = vtanh.f32 %v1904_v9  ;;  %v2019_v19 = vmul.f32 -1.442695, %v1904_v9 }
0x13ff   :  { %2406 = vpow2.f32 %v2018_v15 }
0x1400   :  { %2408 = vpow2.f32 %v2019_v19 }
0x1405   :  { %v2403_v12 = vpop.eup %2402 }
0x1406   :  { %1917 = vrot.lane.b32.xlu0 %v2403_v12, %s2541_s4 }
0x140b   :  { %v2405_v16 = vpop.eup %2404 }
0x140c   :  { %1944 = vrot.lane.b32.xlu1 %v2405_v16, %s2541_s4  ;;  %v2407_v20 = vpop.eup %2406 }
0x140d   :  { %v1908_v22 = vadd.f32 1.0, %v2407_v20  ;;  %v2409_v24 = vpop.eup %2408 }
0x140e   :  { %v1935_v7 = vadd.f32 1.0, %v2409_v24 }
0x140f   :  { %2410 = vrcp.f32 %v1908_v22 }
0x1410   :  { %2412 = vrcp.f32 %v1935_v7 }
0x141c   :  { %v2411_v8 = vpop.eup %2410 }
0x141d   :  { %v2413_v25 = vpop.eup %2412  ;;  %v1915_v18 = vmul.f32 %v2411_v8, %v1913_v0 }
0x141e   :  { %v1942_v30 = vmul.f32 %v2413_v25, %v1940_v14 }
0x1478   :  { %v1918_v11 = vpop.permute.xlu0 %1917 }
0x1479   :  { %v1920_v13 = vmul.f32 %v2411_v8, %v1918_v11 }
0x147b   :  { %1922 = vrot.lane.b32.xlu0 %v1920_v13, %s2542_s15 }
0x147e   :  { %v1945_v26 = vpop.permute.xlu1 %1944 }
0x147f   :  { %v1947_v17 = vmul.f32 %v2413_v25, %v1945_v26 }
0x1481   :  { %1949 = vrot.lane.b32.xlu1 %v1947_v17, %s2542_s15 }
0x14ed   :  { %v1923_v27 = vpop.permute.xlu0 %1922 }
0x14ee   :  { %v1925_v28 = vadd.f32 %v1923_v27, %v1915_v18 }
0x14f0   :  { %2414 = vtanh.f32 %v1925_v28 }
0x14f3   :  { %v1950_v31 = vpop.permute.xlu1 %1949 }
0x14f4   :  { %v1952_v33 = vadd.f32 %v1950_v31, %v1942_v30 }
0x14f6   :  { %2416 = vtanh.f32 %v1952_v33 }
0x14fd   :  { %v2415_v34 = vpop.eup %2414 }
0x14fe   :  { %1928 = vrot.lane.b32.xlu0 %v2415_v34, %s2541_s4 }
0x1502   :  { %399 = vrot.lane.b32.xlu0 %v2667_v5, %s2541_s4 }
0x1503   :  { %v2417_v35 = vpop.eup %2416 }
0x1504   :  { %1955 = vrot.lane.b32.xlu1 %v2417_v35, %s2541_s4 }
0x1506   :  { %624 = vrot.lane.b32.xlu0 %v2712_v55, %s2541_s4 }
0x1508   :  { %617 = vrot.lane.b32.xlu1 %v2708_v52, %s2542_s15 }
0x150a   :  { %852 = vrot.lane.b32.xlu0 %v2756_v43, %s2541_s4 }
0x150c   :  { %845 = vrot.lane.b32.xlu1 %v2752_v40, %s2542_s15 }
0x150e   :  { %1077 = vrot.lane.b32.xlu0 %v2800_v32, %s2541_s4 }
0x1510   :  { %1070 = vrot.lane.b32.xlu1 %v2796_v29, %s2542_s15 }
0x1512   :  { %1515 = vrot.lane.b32.xlu0 %v2884_v61, %s2542_s15 }
0x1514   :  { %1299 = vrot.lane.b32.xlu1 %v2841_v21, %s2541_s4 }
0x1516   :  { %1739 = vrot.lane.b32.xlu0 %v2915_v53, %s2542_s15 }
0x1518   :  { %1520 = vrot.lane.b32.xlu1 %v2888_v1, %s2541_s4 }
0x151c   :  { %1744 = vrot.lane.b32.xlu1 %v2919_v56, %s2541_s4 }
0x1570   :  { %v1929_v5 = vpop.permute.xlu0 %1928 }
0x1571   :  { %v1931_v52 = vmul.f32 %v2411_v8, %v1929_v5 }
0x1573   :  { %1960 = vrot.lane.b32.xlu0 %v1931_v52, %s2542_s15 }
0x1574   :  { %v400_v55 = vpop.permute.xlu0 %399 }
0x1575   :  { %404 = vst.msk [vmem:[#allocation11 + $0x8] sm:$0xc0] %vm403_vm3, %v400_v55 }
0x1576   :  { %v1956_v40 = vpop.permute.xlu1 %1955 }
0x1577   :  { %v1958_v43 = vmul.f32 %v2413_v25, %v1956_v40 }
0x1578   :  { %v625_v29 = vpop.permute.xlu0 %624 }
0x1579   :  { %629 = vst.msk [vmem:[#allocation11 + $0x8] sm:$0x30] %vm628_vm4, %v625_v29  ;;  %1965 = vrot.lane.b32.xlu1 %v1958_v43, %s2541_s4 }
0x157a   :  { %v618_v32 = vpop.permute.xlu1 %617 }
0x157b   :  { %622 = vst.msk [vmem:[#allocation11] sm:$0xc] %vm621_vm5, %v618_v32 }
0x157c   :  { %v853_v21 = vpop.permute.xlu0 %852 }
0x157d   :  { %857 = vst.msk [vmem:[#allocation11 + $0x8] sm:$0xc] %vm856_vm6, %v853_v21 }
0x157e   :  { %v846_v61 = vpop.permute.xlu1 %845 }
0x157f   :  { %850 = vst.msk [vmem:[#allocation11] sm:$0x30] %vm849_vm7, %v846_v61 }
0x1580   :  { %v1078_v1 = vpop.permute.xlu0 %1077 }
0x1581   :  { %1082 = vst.msk [vmem:[#allocation11 + $0x8] sm:$0x3] %vm1081_vm8, %v1078_v1 }
0x1582   :  { %1297 = vst.msk [vmem:[#allocation11 + $0x8] sm:$0x3] %vm396_vm2, %v2845_v23  ;;  %v1071_v36 = vpop.permute.xlu1 %1070 }
0x1583   :  { %1075 = vst.msk [vmem:[#allocation11] sm:$0xc0] %vm1074_vm9, %v1071_v36 }
0x1584   :  { %v1516_v37 = vpop.permute.xlu0 %1515 }
0x1585   :  { %1518 = vst.msk [vmem:[#allocation11 + $0x8] sm:$0xc] %vm621_vm5, %v1516_v37 }
0x1586   :  { %v1300_v38 = vpop.permute.xlu1 %1299 }
0x1587   :  { %1302 = vst.msk [vmem:[#allocation11] sm:$0xc0] %vm403_vm3, %v1300_v38 }
0x1588   :  { %v1740_v39 = vpop.permute.xlu0 %1739 }
0x1589   :  { %1742 = vst.msk [vmem:[#allocation11 + $0x8] sm:$0x30] %vm849_vm7, %v1740_v39 }
0x158a   :  { %v1521_v41 = vpop.permute.xlu1 %1520 }
0x158b   :  { %1523 = vst.msk [vmem:[#allocation11] sm:$0x30] %vm628_vm4, %v1521_v41 }
0x158e   :  { %v1745_v42 = vpop.permute.xlu1 %1744 }
0x158f   :  { %1747 = vst.msk [vmem:[#allocation11] sm:$0xc] %vm856_vm6, %v1745_v42 }
0x15e5   :  { %v1961_v44 = vpop.permute.xlu0 %1960 }
0x15e6   :  { %1963 = vst.msk [vmem:[#allocation11 + $0x8] sm:$0xc0] %vm1074_vm9, %v1961_v44 }
0x15eb   :  { %v1966_v23 = vpop.permute.xlu1 %1965 }
0x15ec   :  { %1968 = vst.msk [vmem:[#allocation11] sm:$0x3] %vm1081_vm8, %v1966_v23 }
0x15ed   :  { %2514 = shalt.err (!%p2511_p10)
}
0x15ee   :  { %s2544_s19 = smov 2  }
0x15ef   :  { %1980 = dma.vmem_to_hbm [thread:$0]  %s1975_s17, 256, %s2983_s5, [#allocation5], %s2542_s15, %s2542_s15, %s2544_s19  }
0x15f0   :  { %2529 = dma.done.wait [#allocation5], 256  }
0x15f1   :  { %2530 = vsyncadd [#allocation5], 4294967040 }
0x15f2   :  { %1984 = vsyncpa [#allocation4], 1 }
0x15f3   :  { %1985 = vsyncpa [#allocation7], 1 }
0x15f4   :  { %1986 = vsyncpa [#allocation10], 1 }
0x15f5   :  { %1987 = vsyncpa [#allocation5], 1 }

</bundles_post_ra>
